<compile_context>
chip_gen: v7x
topology: tpu7x:2x2x1
jax: 0.10.0
libtpu: 0.0.40
codegen_flags: <defaults>
</compile_context>

<pallas_src>
import functools

import jax
import jax.numpy as jnp
from jax.experimental import pallas as pl
from jax.experimental.pallas import tpu as pltpu


def attention_kernel(x_ref, wq_ref, wk_ref, wv_ref, wo_ref, b_ref, o_ref,
                     k_vmem, v_vmem, ctx_vmem, *, num_heads, q_tile):
    """One (batch, q-tile) grid step.

    x_ref   : (1, N, C)   input rows for this batch element
    wq_ref  : (C, C)      q projection (softmax scale pre-folded), head-major cols
    wk_ref  : (C, C)      k projection
    wv_ref  : (C, C)      v projection
    wo_ref  : (C, C)      output projection (head-major input rows)
    b_ref   : (1, C)      output projection bias
    o_ref   : (1, tq, C)  output tile
    k_vmem  : (H, N, hd)  scratch: per-head K, filled once per batch element
    v_vmem  : (H, N, hd)  scratch: per-head V
    ctx_vmem: (tq, C)     scratch: head-concat context for the wide wo matmul
    """
    qi = pl.program_id(1)
    H = num_heads
    N = x_ref.shape[1]
    C = x_ref.shape[2]
    hd = C // H
    cdt = k_vmem.dtype  # MXU operand dtype (follows x.dtype; bf16 if caller uses bf16)

    # ---- K / V projections: once per batch element, full MXU width (C cols) ----
    @pl.when(qi == 0)
    def _():
        xf = x_ref[0]                                                    # (N, C)
        kf = jnp.dot(xf, wk_ref[...], preferred_element_type=jnp.float32)
        for h in range(H):
            k_vmem[h] = kf[:, h * hd:(h + 1) * hd].astype(cdt)
        vf = jnp.dot(xf, wv_ref[...], preferred_element_type=jnp.float32)
        for h in range(H):
            v_vmem[h] = vf[:, h * hd:(h + 1) * hd].astype(cdt)

    # ---- q projection for this tile, full width (scale already folded in) ----
    row0 = pl.multiple_of(qi * q_tile, q_tile)
    xq = x_ref[0, pl.ds(row0, q_tile), :]                                # (tq, C)
    qf = jnp.dot(xq, wq_ref[...], preferred_element_type=jnp.float32)   # (tq, C)

    # ---- per-head attention core ----
    for h in range(H):
        qh = qf[:, h * hd:(h + 1) * hd].astype(cdt)                      # (tq, hd)
        kh = k_vmem[h]                                                   # (N, hd)
        vh = v_vmem[h]                                                   # (N, hd)

        # scores = q @ k^T (NT matmul, no explicit transpose)
        s = jax.lax.dot_general(qh, kh, (((1,), (1,)), ((), ())),
                                preferred_element_type=jnp.float32)      # (tq, N)

        # numerically stable softmax; exact normalization folded in after P@V
        s = s - jnp.max(s, axis=-1, keepdims=True)
        p = jnp.exp(s)                                                   # (tq, N)
        l = jnp.sum(p, axis=-1, keepdims=True)                           # (tq, 1)

        # (softmax(qk^T) - I) @ v  ==  (p @ v) / l  -  v[q rows]
        ctx = jnp.dot(p.astype(cdt), vh,
                      preferred_element_type=jnp.float32)                # (tq, hd)
        ctx = ctx * (1.0 / l) \
            - v_vmem[h, pl.ds(row0, q_tile), :].astype(jnp.float32)

        ctx_vmem[:, h * hd:(h + 1) * hd] = ctx

    # ---- output projection: one wide (tq, C) @ (C, C) matmul + bias ----
    out = jnp.dot(ctx_vmem[...].astype(cdt), wo_ref[...],
                  preferred_element_type=jnp.float32)
    out = out + b_ref[...].astype(jnp.float32)                           # (1, C) bcast
    o_ref[0] = out.astype(o_ref.dtype)


def attention_pallas(x, w_qkv, w_proj, b_proj, num_heads, q_tile=256):
    B, N, C = x.shape
    H = num_heads
    assert C % H == 0, "dim must be divisible by num_heads"
    hd = C // H
    scale = hd ** (-0.5)

    # qkv weight (C, 3C): output columns ordered (3, H, hd).  Split the leading
    # "3" into three full-width (C, C) projections; fold softmax scale into wq.
    w3 = w_qkv.reshape(C, 3, C).transpose(1, 0, 2)                       # (3, C, C)
    wq = w3[0] * jnp.asarray(scale, w_qkv.dtype)
    wk = w3[1]
    wv = w3[2]

    tq = min(q_tile, N)
    assert N % tq == 0, "sequence length must be divisible by the q tile"
    # TODO(synk): pad ragged N / C not multiple of 128 in the wrapper instead of
    # asserting (masked-store path otherwise).

    itemsize = jnp.dtype(x.dtype).itemsize
    # Resident set: x block (x2 buffers) + 4 weights + bias (x2) + out tile (x2)
    # + K/V scratch + ctx scratch + f32 temporaries (projections, per-head scores).
    vmem_bytes = (
        2 * N * C * itemsize                     # x block, double-buffered
        + 2 * (4 * C * C + C) * itemsize         # weights + bias, double-buffered
        + 2 * tq * C * itemsize                  # output tile, double-buffered
        + 2 * H * N * hd * itemsize              # K/V scratch
        + tq * C * 4                             # ctx scratch (f32)
        + 2 * N * C * 4 + 2 * tq * C * 4         # projection temporaries (f32)
        + 4 * tq * N * 4                         # score/exp temporaries (f32)
    )
    vmem_limit = int(1.25 * vmem_bytes)
    vmem_limit = max(32 * 1024 * 1024, min(vmem_limit, 100 * 1024 * 1024))

    kernel = functools.partial(attention_kernel, num_heads=H, q_tile=tq)
    return pl.pallas_call(
        kernel,
        out_shape=jax.ShapeDtypeStruct((B, N, C), x.dtype),
        grid_spec=pltpu.PrefetchScalarGridSpec(
            num_scalar_prefetch=0,
            grid=(B, N // tq),
            in_specs=[
                pl.BlockSpec((1, N, C), lambda b, q: (b, 0, 0)),   # x (one batch row)
                pl.BlockSpec((C, C), lambda b, q: (0, 0)),         # wq (scaled)
                pl.BlockSpec((C, C), lambda b, q: (0, 0)),         # wk
                pl.BlockSpec((C, C), lambda b, q: (0, 0)),         # wv
                pl.BlockSpec((C, C), lambda b, q: (0, 0)),         # wo
                pl.BlockSpec((1, C), lambda b, q: (0, 0)),         # proj bias
            ],
            out_specs=pl.BlockSpec((1, tq, C), lambda b, q: (b, q, 0)),
            scratch_shapes=[
                pltpu.VMEM((H, N, hd), x.dtype),                   # K per batch
                pltpu.VMEM((H, N, hd), x.dtype),                   # V per batch
                pltpu.VMEM((tq, C), jnp.float32),                  # head-concat ctx
            ],
        ),
        compiler_params=pltpu.CompilerParams(
            dimension_semantics=("parallel", "arbitrary"),
            vmem_limit_bytes=vmem_limit),
    )(x, wq, wk, wv, wo := w_proj, b_proj)


def attention_reference(x, w_qkv, w_proj, b_proj, num_heads):
    B, N, C = x.shape
    hd = C // num_heads
    scale = hd ** (-0.5)
    hp = jax.lax.Precision.HIGHEST
    qkv = jnp.einsum('bnc,cd->bnd', x, w_qkv, precision=hp)             # (B, N, 3C)
    qkv = qkv.reshape(B, N, 3, num_heads, hd).transpose(2, 0, 3, 1, 4)
    q, k, v = qkv[0], qkv[1], qkv[2]                                    # (B, H, N, hd)
    attn = jnp.einsum('bhnd,bhmd->bhnm', q, k, precision=hp) * scale
    attn = jax.nn.softmax(attn, axis=-1)
    eye = jnp.eye(N, dtype=attn.dtype)[None, None]
    out = jnp.einsum('bhnm,bhmd->bhnd', attn - eye, v, precision=hp)
    out = out.transpose(0, 2, 1, 3).reshape(B, N, C)
    return jnp.einsum('bnc,cd->bnd', out, w_proj, precision=hp) + b_proj[0]


if __name__ == "__main__":
    B, N, C, H = 2, 16, 128, 8   # small, lane-dense shapes (C multiple of 128)

    key = jax.random.PRNGKey(0)
    kx, kq, kp, kb = jax.random.split(key, 4)

    x = jax.random.normal(kx, (B, N, C), dtype=jnp.float32)
    # qkv: Linear(dim, 3*dim, bias=False) applied as x @ W, W shape (C, 3C)
    w_qkv = jax.random.normal(kq, (C, 3 * C), dtype=jnp.float32) * (1.0 / C ** 0.5)
    # proj: Linear(dim, dim) with bias -> W shape (C, C), bias kept 2-D (1, C)
    w_proj = jax.random.normal(kp, (C, C), dtype=jnp.float32) * (1.0 / C ** 0.5)
    b_proj = jax.random.normal(kb, (1, C), dtype=jnp.float32) * 0.01

    out = attention_pallas(x, w_qkv, w_proj, b_proj, H)
    out = jax.block_until_ready(out)

    ref = attention_reference(x, w_qkv, w_proj, b_proj, H)
    assert out.shape == (B, N, C)
    # Softmax normalization is exact now; tolerance only absorbs MXU f32-pass
    # rounding on real hardware (interpret mode is bit-accurate f32).  Genuine
    # bugs produce O(1) errors, well above this.
    max_err = float(jnp.max(jnp.abs(out - ref)))
    assert jnp.allclose(out, ref, atol=2e-2, rtol=2e-2), \
        f"mismatch vs reference (max abs err {max_err})"

    print("KERNEL_OK")
</pallas_src>

<mosaic_0001>
module attributes {stable_mosaic.version = 11 : i64} {
  func.func @attention_kernel(%arg0: i32, %arg1: i32, %arg2: memref<1x16x128xf32, #tpu.memory_space<vmem>>, %arg3: memref<128x128xf32, #tpu.memory_space<vmem>>, %arg4: memref<128x128xf32, #tpu.memory_space<vmem>>, %arg5: memref<128x128xf32, #tpu.memory_space<vmem>>, %arg6: memref<128x128xf32, #tpu.memory_space<vmem>>, %arg7: memref<1x128xf32, #tpu.memory_space<vmem>>, %arg8: memref<1x16x128xf32, #tpu.memory_space<vmem>>, %arg9: memref<8x16x16xf32, #tpu.memory_space<vmem>>, %arg10: memref<8x16x16xf32, #tpu.memory_space<vmem>>, %arg11: memref<16x128xf32, #tpu.memory_space<vmem>>) attributes {dimension_semantics = [#tpu.dimension_semantics<parallel>, #tpu.dimension_semantics<arbitrary>], iteration_bounds = array<i64: 2, 1>, scalar_prefetch = 0 : i64, scratch_operands = 3 : i64, tpu.core_type = #tpu.core_type<tc>, window_params = [{transform_indices = @transform_0, window_bounds = array<i64: 1, 16, 128>}, {pipeline_mode = #tpu.pipeline_mode<synchronous>, transform_indices = @transform_1, window_bounds = array<i64: 128, 128>}, {pipeline_mode = #tpu.pipeline_mode<synchronous>, transform_indices = @transform_2, window_bounds = array<i64: 128, 128>}, {pipeline_mode = #tpu.pipeline_mode<synchronous>, transform_indices = @transform_3, window_bounds = array<i64: 128, 128>}, {pipeline_mode = #tpu.pipeline_mode<synchronous>, transform_indices = @transform_4, window_bounds = array<i64: 128, 128>}, {pipeline_mode = #tpu.pipeline_mode<synchronous>, transform_indices = @transform_5, window_bounds = array<i64: 1, 128>}, {transform_indices = @transform_6, window_bounds = array<i64: 1, 16, 128>}]} {
    %c0_i32 = arith.constant 0 : i32
    %0 = arith.cmpi eq, %arg1, %c0_i32 : i32
    %1 = arith.extui %0 : i1 to i32
    %c0_i32_0 = arith.constant 0 : i32
    %2 = arith.cmpi ne, %1, %c0_i32_0 : i32
    scf.if %2 {
      %c0_120 = arith.constant 0 : index
      %c0_121 = arith.constant 0 : index
      %c0_122 = arith.constant 0 : index
      %203 = vector.load %arg2[%c0_120, %c0_121, %c0_122] : memref<1x16x128xf32, #tpu.memory_space<vmem>>, vector<1x16x128xf32>
      %204 = vector.shape_cast %203 : vector<1x16x128xf32> to vector<16x128xf32>
      %c0_123 = arith.constant 0 : index
      %c0_124 = arith.constant 0 : index
      %205 = vector.load %arg4[%c0_123, %c0_124] : memref<128x128xf32, #tpu.memory_space<vmem>>, vector<128x128xf32>
      %cst_125 = arith.constant dense<0.000000e+00> : vector<16x128xf32>
      %206 = tpu.matmul %204, %205, %cst_125 {dimension_numbers = #tpu.dot_dimension_numbers<[1], [0], [0], [1], [0, 0, 1, 1], [], []>} : vector<16x128xf32>, vector<128x128xf32>, vector<16x128xf32> -> vector<16x128xf32>
      %207 = vector.extract_strided_slice %206 {offsets = [0, 0], sizes = [16, 16], strides = [1, 1]} : vector<16x128xf32> to vector<16x16xf32>
      %c0_126 = arith.constant 0 : index
      %c0_127 = arith.constant 0 : index
      %c0_128 = arith.constant 0 : index
      %208 = vector.load %arg9[%c0_126, %c0_127, %c0_128] : memref<8x16x16xf32, #tpu.memory_space<vmem>>, vector<1x16x16xf32>
      %209 = vector.shape_cast %208 : vector<1x16x16xf32> to vector<16x16xf32>
      %210 = vector.shape_cast %207 : vector<16x16xf32> to vector<1x16x16xf32>
      tpu.vector_store %arg9[%c0_126, %c0_127, %c0_128], %210 {strides = array<i32>} : memref<8x16x16xf32, #tpu.memory_space<vmem>>, vector<1x16x16xf32>,
      %211 = vector.extract_strided_slice %206 {offsets = [0, 16], sizes = [16, 16], strides = [1, 1]} : vector<16x128xf32> to vector<16x16xf32>
      %c1_129 = arith.constant 1 : index
      %c0_130 = arith.constant 0 : index
      %c0_131 = arith.constant 0 : index
      %212 = vector.load %arg9[%c1_129, %c0_130, %c0_131] : memref<8x16x16xf32, #tpu.memory_space<vmem>>, vector<1x16x16xf32>
      %213 = vector.shape_cast %212 : vector<1x16x16xf32> to vector<16x16xf32>
      %214 = vector.shape_cast %211 : vector<16x16xf32> to vector<1x16x16xf32>
      tpu.vector_store %arg9[%c1_129, %c0_130, %c0_131], %214 {strides = array<i32>} : memref<8x16x16xf32, #tpu.memory_space<vmem>>, vector<1x16x16xf32>,
      %215 = vector.extract_strided_slice %206 {offsets = [0, 32], sizes = [16, 16], strides = [1, 1]} : vector<16x128xf32> to vector<16x16xf32>
      %c2_132 = arith.constant 2 : index
      %c0_133 = arith.constant 0 : index
      %c0_134 = arith.constant 0 : index
      %216 = vector.load %arg9[%c2_132, %c0_133, %c0_134] : memref<8x16x16xf32, #tpu.memory_space<vmem>>, vector<1x16x16xf32>
      %217 = vector.shape_cast %216 : vector<1x16x16xf32> to vector<16x16xf32>
      %218 = vector.shape_cast %215 : vector<16x16xf32> to vector<1x16x16xf32>
      tpu.vector_store %arg9[%c2_132, %c0_133, %c0_134], %218 {strides = array<i32>} : memref<8x16x16xf32, #tpu.memory_space<vmem>>, vector<1x16x16xf32>,
      %219 = vector.extract_strided_slice %206 {offsets = [0, 48], sizes = [16, 16], strides = [1, 1]} : vector<16x128xf32> to vector<16x16xf32>
      %c3_135 = arith.constant 3 : index
      %c0_136 = arith.constant 0 : index
      %c0_137 = arith.constant 0 : index
      %220 = vector.load %arg9[%c3_135, %c0_136, %c0_137] : memref<8x16x16xf32, #tpu.memory_space<vmem>>, vector<1x16x16xf32>
      %221 = vector.shape_cast %220 : vector<1x16x16xf32> to vector<16x16xf32>
      %222 = vector.shape_cast %219 : vector<16x16xf32> to vector<1x16x16xf32>
      tpu.vector_store %arg9[%c3_135, %c0_136, %c0_137], %222 {strides = array<i32>} : memref<8x16x16xf32, #tpu.memory_space<vmem>>, vector<1x16x16xf32>,
      %223 = vector.extract_strided_slice %206 {offsets = [0, 64], sizes = [16, 16], strides = [1, 1]} : vector<16x128xf32> to vector<16x16xf32>
      %c4_138 = arith.constant 4 : index
      %c0_139 = arith.constant 0 : index
      %c0_140 = arith.constant 0 : index
      %224 = vector.load %arg9[%c4_138, %c0_139, %c0_140] : memref<8x16x16xf32, #tpu.memory_space<vmem>>, vector<1x16x16xf32>
      %225 = vector.shape_cast %224 : vector<1x16x16xf32> to vector<16x16xf32>
      %226 = vector.shape_cast %223 : vector<16x16xf32> to vector<1x16x16xf32>
      tpu.vector_store %arg9[%c4_138, %c0_139, %c0_140], %226 {strides = array<i32>} : memref<8x16x16xf32, #tpu.memory_space<vmem>>, vector<1x16x16xf32>,
      %227 = vector.extract_strided_slice %206 {offsets = [0, 80], sizes = [16, 16], strides = [1, 1]} : vector<16x128xf32> to vector<16x16xf32>
      %c5_141 = arith.constant 5 : index
      %c0_142 = arith.constant 0 : index
      %c0_143 = arith.constant 0 : index
      %228 = vector.load %arg9[%c5_141, %c0_142, %c0_143] : memref<8x16x16xf32, #tpu.memory_space<vmem>>, vector<1x16x16xf32>
      %229 = vector.shape_cast %228 : vector<1x16x16xf32> to vector<16x16xf32>
      %230 = vector.shape_cast %227 : vector<16x16xf32> to vector<1x16x16xf32>
      tpu.vector_store %arg9[%c5_141, %c0_142, %c0_143], %230 {strides = array<i32>} : memref<8x16x16xf32, #tpu.memory_space<vmem>>, vector<1x16x16xf32>,
      %231 = vector.extract_strided_slice %206 {offsets = [0, 96], sizes = [16, 16], strides = [1, 1]} : vector<16x128xf32> to vector<16x16xf32>
      %c6_144 = arith.constant 6 : index
      %c0_145 = arith.constant 0 : index
      %c0_146 = arith.constant 0 : index
      %232 = vector.load %arg9[%c6_144, %c0_145, %c0_146] : memref<8x16x16xf32, #tpu.memory_space<vmem>>, vector<1x16x16xf32>
      %233 = vector.shape_cast %232 : vector<1x16x16xf32> to vector<16x16xf32>
      %234 = vector.shape_cast %231 : vector<16x16xf32> to vector<1x16x16xf32>
      tpu.vector_store %arg9[%c6_144, %c0_145, %c0_146], %234 {strides = array<i32>} : memref<8x16x16xf32, #tpu.memory_space<vmem>>, vector<1x16x16xf32>,
      %235 = vector.extract_strided_slice %206 {offsets = [0, 112], sizes = [16, 16], strides = [1, 1]} : vector<16x128xf32> to vector<16x16xf32>
      %c7_147 = arith.constant 7 : index
      %c0_148 = arith.constant 0 : index
      %c0_149 = arith.constant 0 : index
      %236 = vector.load %arg9[%c7_147, %c0_148, %c0_149] : memref<8x16x16xf32, #tpu.memory_space<vmem>>, vector<1x16x16xf32>
      %237 = vector.shape_cast %236 : vector<1x16x16xf32> to vector<16x16xf32>
      %238 = vector.shape_cast %235 : vector<16x16xf32> to vector<1x16x16xf32>
      tpu.vector_store %arg9[%c7_147, %c0_148, %c0_149], %238 {strides = array<i32>} : memref<8x16x16xf32, #tpu.memory_space<vmem>>, vector<1x16x16xf32>,
      %c0_150 = arith.constant 0 : index
      %c0_151 = arith.constant 0 : index
      %239 = vector.load %arg5[%c0_150, %c0_151] : memref<128x128xf32, #tpu.memory_space<vmem>>, vector<128x128xf32>
      %cst_152 = arith.constant dense<0.000000e+00> : vector<16x128xf32>
      %240 = tpu.matmul %204, %239, %cst_152 {dimension_numbers = #tpu.dot_dimension_numbers<[1], [0], [0], [1], [0, 0, 1, 1], [], []>} : vector<16x128xf32>, vector<128x128xf32>, vector<16x128xf32> -> vector<16x128xf32>
      %241 = vector.extract_strided_slice %240 {offsets = [0, 0], sizes = [16, 16], strides = [1, 1]} : vector<16x128xf32> to vector<16x16xf32>
      %c0_153 = arith.constant 0 : index
      %c0_154 = arith.constant 0 : index
      %c0_155 = arith.constant 0 : index
      %242 = vector.load %arg10[%c0_153, %c0_154, %c0_155] : memref<8x16x16xf32, #tpu.memory_space<vmem>>, vector<1x16x16xf32>
      %243 = vector.shape_cast %242 : vector<1x16x16xf32> to vector<16x16xf32>
      %244 = vector.shape_cast %241 : vector<16x16xf32> to vector<1x16x16xf32>
      tpu.vector_store %arg10[%c0_153, %c0_154, %c0_155], %244 {strides = array<i32>} : memref<8x16x16xf32, #tpu.memory_space<vmem>>, vector<1x16x16xf32>,
      %245 = vector.extract_strided_slice %240 {offsets = [0, 16], sizes = [16, 16], strides = [1, 1]} : vector<16x128xf32> to vector<16x16xf32>
      %c1_156 = arith.constant 1 : index
      %c0_157 = arith.constant 0 : index
      %c0_158 = arith.constant 0 : index
      %246 = vector.load %arg10[%c1_156, %c0_157, %c0_158] : memref<8x16x16xf32, #tpu.memory_space<vmem>>, vector<1x16x16xf32>
      %247 = vector.shape_cast %246 : vector<1x16x16xf32> to vector<16x16xf32>
      %248 = vector.shape_cast %245 : vector<16x16xf32> to vector<1x16x16xf32>
      tpu.vector_store %arg10[%c1_156, %c0_157, %c0_158], %248 {strides = array<i32>} : memref<8x16x16xf32, #tpu.memory_space<vmem>>, vector<1x16x16xf32>,
      %249 = vector.extract_strided_slice %240 {offsets = [0, 32], sizes = [16, 16], strides = [1, 1]} : vector<16x128xf32> to vector<16x16xf32>
      %c2_159 = arith.constant 2 : index
      %c0_160 = arith.constant 0 : index
      %c0_161 = arith.constant 0 : index
      %250 = vector.load %arg10[%c2_159, %c0_160, %c0_161] : memref<8x16x16xf32, #tpu.memory_space<vmem>>, vector<1x16x16xf32>
      %251 = vector.shape_cast %250 : vector<1x16x16xf32> to vector<16x16xf32>
      %252 = vector.shape_cast %249 : vector<16x16xf32> to vector<1x16x16xf32>
      tpu.vector_store %arg10[%c2_159, %c0_160, %c0_161], %252 {strides = array<i32>} : memref<8x16x16xf32, #tpu.memory_space<vmem>>, vector<1x16x16xf32>,
      %253 = vector.extract_strided_slice %240 {offsets = [0, 48], sizes = [16, 16], strides = [1, 1]} : vector<16x128xf32> to vector<16x16xf32>
      %c3_162 = arith.constant 3 : index
      %c0_163 = arith.constant 0 : index
      %c0_164 = arith.constant 0 : index
      %254 = vector.load %arg10[%c3_162, %c0_163, %c0_164] : memref<8x16x16xf32, #tpu.memory_space<vmem>>, vector<1x16x16xf32>
      %255 = vector.shape_cast %254 : vector<1x16x16xf32> to vector<16x16xf32>
      %256 = vector.shape_cast %253 : vector<16x16xf32> to vector<1x16x16xf32>
      tpu.vector_store %arg10[%c3_162, %c0_163, %c0_164], %256 {strides = array<i32>} : memref<8x16x16xf32, #tpu.memory_space<vmem>>, vector<1x16x16xf32>,
      %257 = vector.extract_strided_slice %240 {offsets = [0, 64], sizes = [16, 16], strides = [1, 1]} : vector<16x128xf32> to vector<16x16xf32>
      %c4_165 = arith.constant 4 : index
      %c0_166 = arith.constant 0 : index
      %c0_167 = arith.constant 0 : index
      %258 = vector.load %arg10[%c4_165, %c0_166, %c0_167] : memref<8x16x16xf32, #tpu.memory_space<vmem>>, vector<1x16x16xf32>
      %259 = vector.shape_cast %258 : vector<1x16x16xf32> to vector<16x16xf32>
      %260 = vector.shape_cast %257 : vector<16x16xf32> to vector<1x16x16xf32>
      tpu.vector_store %arg10[%c4_165, %c0_166, %c0_167], %260 {strides = array<i32>} : memref<8x16x16xf32, #tpu.memory_space<vmem>>, vector<1x16x16xf32>,
      %261 = vector.extract_strided_slice %240 {offsets = [0, 80], sizes = [16, 16], strides = [1, 1]} : vector<16x128xf32> to vector<16x16xf32>
      %c5_168 = arith.constant 5 : index
      %c0_169 = arith.constant 0 : index
      %c0_170 = arith.constant 0 : index
      %262 = vector.load %arg10[%c5_168, %c0_169, %c0_170] : memref<8x16x16xf32, #tpu.memory_space<vmem>>, vector<1x16x16xf32>
      %263 = vector.shape_cast %262 : vector<1x16x16xf32> to vector<16x16xf32>
      %264 = vector.shape_cast %261 : vector<16x16xf32> to vector<1x16x16xf32>
      tpu.vector_store %arg10[%c5_168, %c0_169, %c0_170], %264 {strides = array<i32>} : memref<8x16x16xf32, #tpu.memory_space<vmem>>, vector<1x16x16xf32>,
      %265 = vector.extract_strided_slice %240 {offsets = [0, 96], sizes = [16, 16], strides = [1, 1]} : vector<16x128xf32> to vector<16x16xf32>
      %c6_171 = arith.constant 6 : index
      %c0_172 = arith.constant 0 : index
      %c0_173 = arith.constant 0 : index
      %266 = vector.load %arg10[%c6_171, %c0_172, %c0_173] : memref<8x16x16xf32, #tpu.memory_space<vmem>>, vector<1x16x16xf32>
      %267 = vector.shape_cast %266 : vector<1x16x16xf32> to vector<16x16xf32>
      %268 = vector.shape_cast %265 : vector<16x16xf32> to vector<1x16x16xf32>
      tpu.vector_store %arg10[%c6_171, %c0_172, %c0_173], %268 {strides = array<i32>} : memref<8x16x16xf32, #tpu.memory_space<vmem>>, vector<1x16x16xf32>,
      %269 = vector.extract_strided_slice %240 {offsets = [0, 112], sizes = [16, 16], strides = [1, 1]} : vector<16x128xf32> to vector<16x16xf32>
      %c7_174 = arith.constant 7 : index
      %c0_175 = arith.constant 0 : index
      %c0_176 = arith.constant 0 : index
      %270 = vector.load %arg10[%c7_174, %c0_175, %c0_176] : memref<8x16x16xf32, #tpu.memory_space<vmem>>, vector<1x16x16xf32>
      %271 = vector.shape_cast %270 : vector<1x16x16xf32> to vector<16x16xf32>
      %272 = vector.shape_cast %269 : vector<16x16xf32> to vector<1x16x16xf32>
      tpu.vector_store %arg10[%c7_174, %c0_175, %c0_176], %272 {strides = array<i32>} : memref<8x16x16xf32, #tpu.memory_space<vmem>>, vector<1x16x16xf32>,
    } else {
    }
    %c16_i32 = arith.constant 16 : i32
    %3 = arith.muli %arg1, %c16_i32 : i32
    %4 = tpu.assume_multiple %3, 16 : i32
    %c0 = arith.constant 0 : index
    %5 = arith.index_cast %4 : i32 to index
    %c0_1 = arith.constant 0 : index
    %6 = vector.load %arg2[%c0, %5, %c0_1] : memref<1x16x128xf32, #tpu.memory_space<vmem>>, vector<1x16x128xf32>
    %7 = vector.shape_cast %6 : vector<1x16x128xf32> to vector<16x128xf32>
    %c0_2 = arith.constant 0 : index
    %c0_3 = arith.constant 0 : index
    %8 = vector.load %arg3[%c0_2, %c0_3] : memref<128x128xf32, #tpu.memory_space<vmem>>, vector<128x128xf32>
    %cst = arith.constant dense<0.000000e+00> : vector<16x128xf32>
    %9 = tpu.matmul %7, %8, %cst {dimension_numbers = #tpu.dot_dimension_numbers<[1], [0], [0], [1], [0, 0, 1, 1], [], []>} : vector<16x128xf32>, vector<128x128xf32>, vector<16x128xf32> -> vector<16x128xf32>
    %10 = vector.extract_strided_slice %9 {offsets = [0, 0], sizes = [16, 16], strides = [1, 1]} : vector<16x128xf32> to vector<16x16xf32>
    %c0_4 = arith.constant 0 : index
    %c0_5 = arith.constant 0 : index
    %c0_6 = arith.constant 0 : index
    %11 = vector.load %arg9[%c0_4, %c0_5, %c0_6] : memref<8x16x16xf32, #tpu.memory_space<vmem>>, vector<1x16x16xf32>
    %12 = vector.shape_cast %11 : vector<1x16x16xf32> to vector<16x16xf32>
    %c0_7 = arith.constant 0 : index
    %c0_8 = arith.constant 0 : index
    %c0_9 = arith.constant 0 : index
    %13 = vector.load %arg10[%c0_7, %c0_8, %c0_9] : memref<8x16x16xf32, #tpu.memory_space<vmem>>, vector<1x16x16xf32>
    %14 = vector.shape_cast %13 : vector<1x16x16xf32> to vector<16x16xf32>
    %cst_10 = arith.constant dense<0.000000e+00> : vector<16x16xf32>
    %15 = tpu.matmul %10, %12, %cst_10 {dimension_numbers = #tpu.dot_dimension_numbers<[1], [1], [0], [0], [0, 0, 1, 0], [], []>} : vector<16x16xf32>, vector<16x16xf32>, vector<16x16xf32> -> vector<16x16xf32>
    %cst_11 = arith.constant dense<0xFF800000> : vector<16xf32>
    %16 = vector.multi_reduction <maximumf>, %15, %cst_11 [1] : vector<16x16xf32> to vector<16xf32>
    %17 = vector.shape_cast %16 : vector<16xf32> to vector<16x1xf32>
    %18 = vector.broadcast %17 : vector<16x1xf32> to vector<16x16xf32>
    %19 = arith.subf %15, %18 : vector<16x16xf32>
    %20 = math.exp %19 : vector<16x16xf32>
    %cst_12 = arith.constant dense<0.000000e+00> : vector<16xf32>
    %21 = vector.multi_reduction <add>, %20, %cst_12 [1] : vector<16x16xf32> to vector<16xf32>
    %22 = vector.shape_cast %21 : vector<16xf32> to vector<16x1xf32>
    %cst_13 = arith.constant dense<0.000000e+00> : vector<16x16xf32>
    %23 = tpu.matmul %20, %14, %cst_13 {dimension_numbers = #tpu.dot_dimension_numbers<[1], [0], [0], [1], [0, 0, 1, 1], [], []>} : vector<16x16xf32>, vector<16x16xf32>, vector<16x16xf32> -> vector<16x16xf32>
    %cst_14 = arith.constant 1.000000e+00 : f32
    %24 = vector.broadcast %cst_14 : f32 to vector<16x1xf32>
    %25 = arith.divf %24, %22 : vector<16x1xf32>
    %26 = vector.broadcast %25 : vector<16x1xf32> to vector<16x16xf32>
    %27 = arith.mulf %23, %26 : vector<16x16xf32>
    %c0_15 = arith.constant 0 : index
    %28 = arith.index_cast %4 : i32 to index
    %c0_16 = arith.constant 0 : index
    %29 = vector.load %arg10[%c0_15, %28, %c0_16] : memref<8x16x16xf32, #tpu.memory_space<vmem>>, vector<1x16x16xf32>
    %30 = vector.shape_cast %29 : vector<1x16x16xf32> to vector<16x16xf32>
    %31 = arith.subf %27, %30 : vector<16x16xf32>
    %c0_17 = arith.constant 0 : index
    %c0_18 = arith.constant 0 : index
    %32 = vector.load %arg11[%c0_17, %c0_18] : memref<16x128xf32, #tpu.memory_space<vmem>>, vector<16x16xf32>
    tpu.vector_store %arg11[%c0_17, %c0_18], %31 {strides = array<i32>} : memref<16x128xf32, #tpu.memory_space<vmem>>, vector<16x16xf32>,
    %33 = vector.extract_strided_slice %9 {offsets = [0, 16], sizes = [16, 16], strides = [1, 1]} : vector<16x128xf32> to vector<16x16xf32>
    %c1 = arith.constant 1 : index
    %c0_19 = arith.constant 0 : index
    %c0_20 = arith.constant 0 : index
    %34 = vector.load %arg9[%c1, %c0_19, %c0_20] : memref<8x16x16xf32, #tpu.memory_space<vmem>>, vector<1x16x16xf32>
    %35 = vector.shape_cast %34 : vector<1x16x16xf32> to vector<16x16xf32>
    %c1_21 = arith.constant 1 : index
    %c0_22 = arith.constant 0 : index
    %c0_23 = arith.constant 0 : index
    %36 = vector.load %arg10[%c1_21, %c0_22, %c0_23] : memref<8x16x16xf32, #tpu.memory_space<vmem>>, vector<1x16x16xf32>
    %37 = vector.shape_cast %36 : vector<1x16x16xf32> to vector<16x16xf32>
    %cst_24 = arith.constant dense<0.000000e+00> : vector<16x16xf32>
    %38 = tpu.matmul %33, %35, %cst_24 {dimension_numbers = #tpu.dot_dimension_numbers<[1], [1], [0], [0], [0, 0, 1, 0], [], []>} : vector<16x16xf32>, vector<16x16xf32>, vector<16x16xf32> -> vector<16x16xf32>
    %cst_25 = arith.constant dense<0xFF800000> : vector<16xf32>
    %39 = vector.multi_reduction <maximumf>, %38, %cst_25 [1] : vector<16x16xf32> to vector<16xf32>
    %40 = vector.shape_cast %39 : vector<16xf32> to vector<16x1xf32>
    %41 = vector.broadcast %40 : vector<16x1xf32> to vector<16x16xf32>
    %42 = arith.subf %38, %41 : vector<16x16xf32>
    %43 = math.exp %42 : vector<16x16xf32>
    %cst_26 = arith.constant dense<0.000000e+00> : vector<16xf32>
    %44 = vector.multi_reduction <add>, %43, %cst_26 [1] : vector<16x16xf32> to vector<16xf32>
    %45 = vector.shape_cast %44 : vector<16xf32> to vector<16x1xf32>
    %cst_27 = arith.constant dense<0.000000e+00> : vector<16x16xf32>
    %46 = tpu.matmul %43, %37, %cst_27 {dimension_numbers = #tpu.dot_dimension_numbers<[1], [0], [0], [1], [0, 0, 1, 1], [], []>} : vector<16x16xf32>, vector<16x16xf32>, vector<16x16xf32> -> vector<16x16xf32>
    %cst_28 = arith.constant 1.000000e+00 : f32
    %47 = vector.broadcast %cst_28 : f32 to vector<16x1xf32>
    %48 = arith.divf %47, %45 : vector<16x1xf32>
    %49 = vector.broadcast %48 : vector<16x1xf32> to vector<16x16xf32>
    %50 = arith.mulf %46, %49 : vector<16x16xf32>
    %c1_29 = arith.constant 1 : index
    %51 = arith.index_cast %4 : i32 to index
    %c0_30 = arith.constant 0 : index
    %52 = vector.load %arg10[%c1_29, %51, %c0_30] : memref<8x16x16xf32, #tpu.memory_space<vmem>>, vector<1x16x16xf32>
    %53 = vector.shape_cast %52 : vector<1x16x16xf32> to vector<16x16xf32>
    %54 = arith.subf %50, %53 : vector<16x16xf32>
    %c0_31 = arith.constant 0 : index
    %c16 = arith.constant 16 : index
    %55 = vector.load %arg11[%c0_31, %c16] : memref<16x128xf32, #tpu.memory_space<vmem>>, vector<16x16xf32>
    tpu.vector_store %arg11[%c0_31, %c16], %54 {strides = array<i32>} : memref<16x128xf32, #tpu.memory_space<vmem>>, vector<16x16xf32>,
    %56 = vector.extract_strided_slice %9 {offsets = [0, 32], sizes = [16, 16], strides = [1, 1]} : vector<16x128xf32> to vector<16x16xf32>
    %c2 = arith.constant 2 : index
    %c0_32 = arith.constant 0 : index
    %c0_33 = arith.constant 0 : index
    %57 = vector.load %arg9[%c2, %c0_32, %c0_33] : memref<8x16x16xf32, #tpu.memory_space<vmem>>, vector<1x16x16xf32>
    %58 = vector.shape_cast %57 : vector<1x16x16xf32> to vector<16x16xf32>
    %c2_34 = arith.constant 2 : index
    %c0_35 = arith.constant 0 : index
    %c0_36 = arith.constant 0 : index
    %59 = vector.load %arg10[%c2_34, %c0_35, %c0_36] : memref<8x16x16xf32, #tpu.memory_space<vmem>>, vector<1x16x16xf32>
    %60 = vector.shape_cast %59 : vector<1x16x16xf32> to vector<16x16xf32>
    %cst_37 = arith.constant dense<0.000000e+00> : vector<16x16xf32>
    %61 = tpu.matmul %56, %58, %cst_37 {dimension_numbers = #tpu.dot_dimension_numbers<[1], [1], [0], [0], [0, 0, 1, 0], [], []>} : vector<16x16xf32>, vector<16x16xf32>, vector<16x16xf32> -> vector<16x16xf32>
    %cst_38 = arith.constant dense<0xFF800000> : vector<16xf32>
    %62 = vector.multi_reduction <maximumf>, %61, %cst_38 [1] : vector<16x16xf32> to vector<16xf32>
    %63 = vector.shape_cast %62 : vector<16xf32> to vector<16x1xf32>
    %64 = vector.broadcast %63 : vector<16x1xf32> to vector<16x16xf32>
    %65 = arith.subf %61, %64 : vector<16x16xf32>
    %66 = math.exp %65 : vector<16x16xf32>
    %cst_39 = arith.constant dense<0.000000e+00> : vector<16xf32>
    %67 = vector.multi_reduction <add>, %66, %cst_39 [1] : vector<16x16xf32> to vector<16xf32>
    %68 = vector.shape_cast %67 : vector<16xf32> to vector<16x1xf32>
    %cst_40 = arith.constant dense<0.000000e+00> : vector<16x16xf32>
    %69 = tpu.matmul %66, %60, %cst_40 {dimension_numbers = #tpu.dot_dimension_numbers<[1], [0], [0], [1], [0, 0, 1, 1], [], []>} : vector<16x16xf32>, vector<16x16xf32>, vector<16x16xf32> -> vector<16x16xf32>
    %cst_41 = arith.constant 1.000000e+00 : f32
    %70 = vector.broadcast %cst_41 : f32 to vector<16x1xf32>
    %71 = arith.divf %70, %68 : vector<16x1xf32>
    %72 = vector.broadcast %71 : vector<16x1xf32> to vector<16x16xf32>
    %73 = arith.mulf %69, %72 : vector<16x16xf32>
    %c2_42 = arith.constant 2 : index
    %74 = arith.index_cast %4 : i32 to index
    %c0_43 = arith.constant 0 : index
    %75 = vector.load %arg10[%c2_42, %74, %c0_43] : memref<8x16x16xf32, #tpu.memory_space<vmem>>, vector<1x16x16xf32>
    %76 = vector.shape_cast %75 : vector<1x16x16xf32> to vector<16x16xf32>
    %77 = arith.subf %73, %76 : vector<16x16xf32>
    %c0_44 = arith.constant 0 : index
    %c32 = arith.constant 32 : index
    %78 = vector.load %arg11[%c0_44, %c32] : memref<16x128xf32, #tpu.memory_space<vmem>>, vector<16x16xf32>
    tpu.vector_store %arg11[%c0_44, %c32], %77 {strides = array<i32>} : memref<16x128xf32, #tpu.memory_space<vmem>>, vector<16x16xf32>,
    %79 = vector.extract_strided_slice %9 {offsets = [0, 48], sizes = [16, 16], strides = [1, 1]} : vector<16x128xf32> to vector<16x16xf32>
    %c3 = arith.constant 3 : index
    %c0_45 = arith.constant 0 : index
    %c0_46 = arith.constant 0 : index
    %80 = vector.load %arg9[%c3, %c0_45, %c0_46] : memref<8x16x16xf32, #tpu.memory_space<vmem>>, vector<1x16x16xf32>
    %81 = vector.shape_cast %80 : vector<1x16x16xf32> to vector<16x16xf32>
    %c3_47 = arith.constant 3 : index
    %c0_48 = arith.constant 0 : index
    %c0_49 = arith.constant 0 : index
    %82 = vector.load %arg10[%c3_47, %c0_48, %c0_49] : memref<8x16x16xf32, #tpu.memory_space<vmem>>, vector<1x16x16xf32>
    %83 = vector.shape_cast %82 : vector<1x16x16xf32> to vector<16x16xf32>
    %cst_50 = arith.constant dense<0.000000e+00> : vector<16x16xf32>
    %84 = tpu.matmul %79, %81, %cst_50 {dimension_numbers = #tpu.dot_dimension_numbers<[1], [1], [0], [0], [0, 0, 1, 0], [], []>} : vector<16x16xf32>, vector<16x16xf32>, vector<16x16xf32> -> vector<16x16xf32>
    %cst_51 = arith.constant dense<0xFF800000> : vector<16xf32>
    %85 = vector.multi_reduction <maximumf>, %84, %cst_51 [1] : vector<16x16xf32> to vector<16xf32>
    %86 = vector.shape_cast %85 : vector<16xf32> to vector<16x1xf32>
    %87 = vector.broadcast %86 : vector<16x1xf32> to vector<16x16xf32>
    %88 = arith.subf %84, %87 : vector<16x16xf32>
    %89 = math.exp %88 : vector<16x16xf32>
    %cst_52 = arith.constant dense<0.000000e+00> : vector<16xf32>
    %90 = vector.multi_reduction <add>, %89, %cst_52 [1] : vector<16x16xf32> to vector<16xf32>
    %91 = vector.shape_cast %90 : vector<16xf32> to vector<16x1xf32>
    %cst_53 = arith.constant dense<0.000000e+00> : vector<16x16xf32>
    %92 = tpu.matmul %89, %83, %cst_53 {dimension_numbers = #tpu.dot_dimension_numbers<[1], [0], [0], [1], [0, 0, 1, 1], [], []>} : vector<16x16xf32>, vector<16x16xf32>, vector<16x16xf32> -> vector<16x16xf32>
    %cst_54 = arith.constant 1.000000e+00 : f32
    %93 = vector.broadcast %cst_54 : f32 to vector<16x1xf32>
    %94 = arith.divf %93, %91 : vector<16x1xf32>
    %95 = vector.broadcast %94 : vector<16x1xf32> to vector<16x16xf32>
    %96 = arith.mulf %92, %95 : vector<16x16xf32>
    %c3_55 = arith.constant 3 : index
    %97 = arith.index_cast %4 : i32 to index
    %c0_56 = arith.constant 0 : index
    %98 = vector.load %arg10[%c3_55, %97, %c0_56] : memref<8x16x16xf32, #tpu.memory_space<vmem>>, vector<1x16x16xf32>
    %99 = vector.shape_cast %98 : vector<1x16x16xf32> to vector<16x16xf32>
    %100 = arith.subf %96, %99 : vector<16x16xf32>
    %c0_57 = arith.constant 0 : index
    %c48 = arith.constant 48 : index
    %101 = vector.load %arg11[%c0_57, %c48] : memref<16x128xf32, #tpu.memory_space<vmem>>, vector<16x16xf32>
    tpu.vector_store %arg11[%c0_57, %c48], %100 {strides = array<i32>} : memref<16x128xf32, #tpu.memory_space<vmem>>, vector<16x16xf32>,
    %102 = vector.extract_strided_slice %9 {offsets = [0, 64], sizes = [16, 16], strides = [1, 1]} : vector<16x128xf32> to vector<16x16xf32>
    %c4 = arith.constant 4 : index
    %c0_58 = arith.constant 0 : index
    %c0_59 = arith.constant 0 : index
    %103 = vector.load %arg9[%c4, %c0_58, %c0_59] : memref<8x16x16xf32, #tpu.memory_space<vmem>>, vector<1x16x16xf32>
    %104 = vector.shape_cast %103 : vector<1x16x16xf32> to vector<16x16xf32>
    %c4_60 = arith.constant 4 : index
    %c0_61 = arith.constant 0 : index
    %c0_62 = arith.constant 0 : index
    %105 = vector.load %arg10[%c4_60, %c0_61, %c0_62] : memref<8x16x16xf32, #tpu.memory_space<vmem>>, vector<1x16x16xf32>
    %106 = vector.shape_cast %105 : vector<1x16x16xf32> to vector<16x16xf32>
    %cst_63 = arith.constant dense<0.000000e+00> : vector<16x16xf32>
    %107 = tpu.matmul %102, %104, %cst_63 {dimension_numbers = #tpu.dot_dimension_numbers<[1], [1], [0], [0], [0, 0, 1, 0], [], []>} : vector<16x16xf32>, vector<16x16xf32>, vector<16x16xf32> -> vector<16x16xf32>
    %cst_64 = arith.constant dense<0xFF800000> : vector<16xf32>
    %108 = vector.multi_reduction <maximumf>, %107, %cst_64 [1] : vector<16x16xf32> to vector<16xf32>
    %109 = vector.shape_cast %108 : vector<16xf32> to vector<16x1xf32>
    %110 = vector.broadcast %109 : vector<16x1xf32> to vector<16x16xf32>
    %111 = arith.subf %107, %110 : vector<16x16xf32>
    %112 = math.exp %111 : vector<16x16xf32>
    %cst_65 = arith.constant dense<0.000000e+00> : vector<16xf32>
    %113 = vector.multi_reduction <add>, %112, %cst_65 [1] : vector<16x16xf32> to vector<16xf32>
    %114 = vector.shape_cast %113 : vector<16xf32> to vector<16x1xf32>
    %cst_66 = arith.constant dense<0.000000e+00> : vector<16x16xf32>
    %115 = tpu.matmul %112, %106, %cst_66 {dimension_numbers = #tpu.dot_dimension_numbers<[1], [0], [0], [1], [0, 0, 1, 1], [], []>} : vector<16x16xf32>, vector<16x16xf32>, vector<16x16xf32> -> vector<16x16xf32>
    %cst_67 = arith.constant 1.000000e+00 : f32
    %116 = vector.broadcast %cst_67 : f32 to vector<16x1xf32>
    %117 = arith.divf %116, %114 : vector<16x1xf32>
    %118 = vector.broadcast %117 : vector<16x1xf32> to vector<16x16xf32>
    %119 = arith.mulf %115, %118 : vector<16x16xf32>
    %c4_68 = arith.constant 4 : index
    %120 = arith.index_cast %4 : i32 to index
    %c0_69 = arith.constant 0 : index
    %121 = vector.load %arg10[%c4_68, %120, %c0_69] : memref<8x16x16xf32, #tpu.memory_space<vmem>>, vector<1x16x16xf32>
    %122 = vector.shape_cast %121 : vector<1x16x16xf32> to vector<16x16xf32>
    %123 = arith.subf %119, %122 : vector<16x16xf32>
    %c0_70 = arith.constant 0 : index
    %c64 = arith.constant 64 : index
    %124 = vector.load %arg11[%c0_70, %c64] : memref<16x128xf32, #tpu.memory_space<vmem>>, vector<16x16xf32>
    tpu.vector_store %arg11[%c0_70, %c64], %123 {strides = array<i32>} : memref<16x128xf32, #tpu.memory_space<vmem>>, vector<16x16xf32>,
    %125 = vector.extract_strided_slice %9 {offsets = [0, 80], sizes = [16, 16], strides = [1, 1]} : vector<16x128xf32> to vector<16x16xf32>
    %c5 = arith.constant 5 : index
    %c0_71 = arith.constant 0 : index
    %c0_72 = arith.constant 0 : index
    %126 = vector.load %arg9[%c5, %c0_71, %c0_72] : memref<8x16x16xf32, #tpu.memory_space<vmem>>, vector<1x16x16xf32>
    %127 = vector.shape_cast %126 : vector<1x16x16xf32> to vector<16x16xf32>
    %c5_73 = arith.constant 5 : index
    %c0_74 = arith.constant 0 : index
    %c0_75 = arith.constant 0 : index
    %128 = vector.load %arg10[%c5_73, %c0_74, %c0_75] : memref<8x16x16xf32, #tpu.memory_space<vmem>>, vector<1x16x16xf32>
    %129 = vector.shape_cast %128 : vector<1x16x16xf32> to vector<16x16xf32>
    %cst_76 = arith.constant dense<0.000000e+00> : vector<16x16xf32>
    %130 = tpu.matmul %125, %127, %cst_76 {dimension_numbers = #tpu.dot_dimension_numbers<[1], [1], [0], [0], [0, 0, 1, 0], [], []>} : vector<16x16xf32>, vector<16x16xf32>, vector<16x16xf32> -> vector<16x16xf32>
    %cst_77 = arith.constant dense<0xFF800000> : vector<16xf32>
    %131 = vector.multi_reduction <maximumf>, %130, %cst_77 [1] : vector<16x16xf32> to vector<16xf32>
    %132 = vector.shape_cast %131 : vector<16xf32> to vector<16x1xf32>
    %133 = vector.broadcast %132 : vector<16x1xf32> to vector<16x16xf32>
    %134 = arith.subf %130, %133 : vector<16x16xf32>
    %135 = math.exp %134 : vector<16x16xf32>
    %cst_78 = arith.constant dense<0.000000e+00> : vector<16xf32>
    %136 = vector.multi_reduction <add>, %135, %cst_78 [1] : vector<16x16xf32> to vector<16xf32>
    %137 = vector.shape_cast %136 : vector<16xf32> to vector<16x1xf32>
    %cst_79 = arith.constant dense<0.000000e+00> : vector<16x16xf32>
    %138 = tpu.matmul %135, %129, %cst_79 {dimension_numbers = #tpu.dot_dimension_numbers<[1], [0], [0], [1], [0, 0, 1, 1], [], []>} : vector<16x16xf32>, vector<16x16xf32>, vector<16x16xf32> -> vector<16x16xf32>
    %cst_80 = arith.constant 1.000000e+00 : f32
    %139 = vector.broadcast %cst_80 : f32 to vector<16x1xf32>
    %140 = arith.divf %139, %137 : vector<16x1xf32>
    %141 = vector.broadcast %140 : vector<16x1xf32> to vector<16x16xf32>
    %142 = arith.mulf %138, %141 : vector<16x16xf32>
    %c5_81 = arith.constant 5 : index
    %143 = arith.index_cast %4 : i32 to index
    %c0_82 = arith.constant 0 : index
    %144 = vector.load %arg10[%c5_81, %143, %c0_82] : memref<8x16x16xf32, #tpu.memory_space<vmem>>, vector<1x16x16xf32>
    %145 = vector.shape_cast %144 : vector<1x16x16xf32> to vector<16x16xf32>
    %146 = arith.subf %142, %145 : vector<16x16xf32>
    %c0_83 = arith.constant 0 : index
    %c80 = arith.constant 80 : index
    %147 = vector.load %arg11[%c0_83, %c80] : memref<16x128xf32, #tpu.memory_space<vmem>>, vector<16x16xf32>
    tpu.vector_store %arg11[%c0_83, %c80], %146 {strides = array<i32>} : memref<16x128xf32, #tpu.memory_space<vmem>>, vector<16x16xf32>,
    %148 = vector.extract_strided_slice %9 {offsets = [0, 96], sizes = [16, 16], strides = [1, 1]} : vector<16x128xf32> to vector<16x16xf32>
    %c6 = arith.constant 6 : index
    %c0_84 = arith.constant 0 : index
    %c0_85 = arith.constant 0 : index
    %149 = vector.load %arg9[%c6, %c0_84, %c0_85] : memref<8x16x16xf32, #tpu.memory_space<vmem>>, vector<1x16x16xf32>
    %150 = vector.shape_cast %149 : vector<1x16x16xf32> to vector<16x16xf32>
    %c6_86 = arith.constant 6 : index
    %c0_87 = arith.constant 0 : index
    %c0_88 = arith.constant 0 : index
    %151 = vector.load %arg10[%c6_86, %c0_87, %c0_88] : memref<8x16x16xf32, #tpu.memory_space<vmem>>, vector<1x16x16xf32>
    %152 = vector.shape_cast %151 : vector<1x16x16xf32> to vector<16x16xf32>
    %cst_89 = arith.constant dense<0.000000e+00> : vector<16x16xf32>
    %153 = tpu.matmul %148, %150, %cst_89 {dimension_numbers = #tpu.dot_dimension_numbers<[1], [1], [0], [0], [0, 0, 1, 0], [], []>} : vector<16x16xf32>, vector<16x16xf32>, vector<16x16xf32> -> vector<16x16xf32>
    %cst_90 = arith.constant dense<0xFF800000> : vector<16xf32>
    %154 = vector.multi_reduction <maximumf>, %153, %cst_90 [1] : vector<16x16xf32> to vector<16xf32>
    %155 = vector.shape_cast %154 : vector<16xf32> to vector<16x1xf32>
    %156 = vector.broadcast %155 : vector<16x1xf32> to vector<16x16xf32>
    %157 = arith.subf %153, %156 : vector<16x16xf32>
    %158 = math.exp %157 : vector<16x16xf32>
    %cst_91 = arith.constant dense<0.000000e+00> : vector<16xf32>
    %159 = vector.multi_reduction <add>, %158, %cst_91 [1] : vector<16x16xf32> to vector<16xf32>
    %160 = vector.shape_cast %159 : vector<16xf32> to vector<16x1xf32>
    %cst_92 = arith.constant dense<0.000000e+00> : vector<16x16xf32>
    %161 = tpu.matmul %158, %152, %cst_92 {dimension_numbers = #tpu.dot_dimension_numbers<[1], [0], [0], [1], [0, 0, 1, 1], [], []>} : vector<16x16xf32>, vector<16x16xf32>, vector<16x16xf32> -> vector<16x16xf32>
    %cst_93 = arith.constant 1.000000e+00 : f32
    %162 = vector.broadcast %cst_93 : f32 to vector<16x1xf32>
    %163 = arith.divf %162, %160 : vector<16x1xf32>
    %164 = vector.broadcast %163 : vector<16x1xf32> to vector<16x16xf32>
    %165 = arith.mulf %161, %164 : vector<16x16xf32>
    %c6_94 = arith.constant 6 : index
    %166 = arith.index_cast %4 : i32 to index
    %c0_95 = arith.constant 0 : index
    %167 = vector.load %arg10[%c6_94, %166, %c0_95] : memref<8x16x16xf32, #tpu.memory_space<vmem>>, vector<1x16x16xf32>
    %168 = vector.shape_cast %167 : vector<1x16x16xf32> to vector<16x16xf32>
    %169 = arith.subf %165, %168 : vector<16x16xf32>
    %c0_96 = arith.constant 0 : index
    %c96 = arith.constant 96 : index
    %170 = vector.load %arg11[%c0_96, %c96] : memref<16x128xf32, #tpu.memory_space<vmem>>, vector<16x16xf32>
    tpu.vector_store %arg11[%c0_96, %c96], %169 {strides = array<i32>} : memref<16x128xf32, #tpu.memory_space<vmem>>, vector<16x16xf32>,
    %171 = vector.extract_strided_slice %9 {offsets = [0, 112], sizes = [16, 16], strides = [1, 1]} : vector<16x128xf32> to vector<16x16xf32>
    %c7 = arith.constant 7 : index
    %c0_97 = arith.constant 0 : index
    %c0_98 = arith.constant 0 : index
    %172 = vector.load %arg9[%c7, %c0_97, %c0_98] : memref<8x16x16xf32, #tpu.memory_space<vmem>>, vector<1x16x16xf32>
    %173 = vector.shape_cast %172 : vector<1x16x16xf32> to vector<16x16xf32>
    %c7_99 = arith.constant 7 : index
    %c0_100 = arith.constant 0 : index
    %c0_101 = arith.constant 0 : index
    %174 = vector.load %arg10[%c7_99, %c0_100, %c0_101] : memref<8x16x16xf32, #tpu.memory_space<vmem>>, vector<1x16x16xf32>
    %175 = vector.shape_cast %174 : vector<1x16x16xf32> to vector<16x16xf32>
    %cst_102 = arith.constant dense<0.000000e+00> : vector<16x16xf32>
    %176 = tpu.matmul %171, %173, %cst_102 {dimension_numbers = #tpu.dot_dimension_numbers<[1], [1], [0], [0], [0, 0, 1, 0], [], []>} : vector<16x16xf32>, vector<16x16xf32>, vector<16x16xf32> -> vector<16x16xf32>
    %cst_103 = arith.constant dense<0xFF800000> : vector<16xf32>
    %177 = vector.multi_reduction <maximumf>, %176, %cst_103 [1] : vector<16x16xf32> to vector<16xf32>
    %178 = vector.shape_cast %177 : vector<16xf32> to vector<16x1xf32>
    %179 = vector.broadcast %178 : vector<16x1xf32> to vector<16x16xf32>
    %180 = arith.subf %176, %179 : vector<16x16xf32>
    %181 = math.exp %180 : vector<16x16xf32>
    %cst_104 = arith.constant dense<0.000000e+00> : vector<16xf32>
    %182 = vector.multi_reduction <add>, %181, %cst_104 [1] : vector<16x16xf32> to vector<16xf32>
    %183 = vector.shape_cast %182 : vector<16xf32> to vector<16x1xf32>
    %cst_105 = arith.constant dense<0.000000e+00> : vector<16x16xf32>
    %184 = tpu.matmul %181, %175, %cst_105 {dimension_numbers = #tpu.dot_dimension_numbers<[1], [0], [0], [1], [0, 0, 1, 1], [], []>} : vector<16x16xf32>, vector<16x16xf32>, vector<16x16xf32> -> vector<16x16xf32>
    %cst_106 = arith.constant 1.000000e+00 : f32
    %185 = vector.broadcast %cst_106 : f32 to vector<16x1xf32>
    %186 = arith.divf %185, %183 : vector<16x1xf32>
    %187 = vector.broadcast %186 : vector<16x1xf32> to vector<16x16xf32>
    %188 = arith.mulf %184, %187 : vector<16x16xf32>
    %c7_107 = arith.constant 7 : index
    %189 = arith.index_cast %4 : i32 to index
    %c0_108 = arith.constant 0 : index
    %190 = vector.load %arg10[%c7_107, %189, %c0_108] : memref<8x16x16xf32, #tpu.memory_space<vmem>>, vector<1x16x16xf32>
    %191 = vector.shape_cast %190 : vector<1x16x16xf32> to vector<16x16xf32>
    %192 = arith.subf %188, %191 : vector<16x16xf32>
    %c0_109 = arith.constant 0 : index
    %c112 = arith.constant 112 : index
    %193 = vector.load %arg11[%c0_109, %c112] : memref<16x128xf32, #tpu.memory_space<vmem>>, vector<16x16xf32>
    tpu.vector_store %arg11[%c0_109, %c112], %192 {strides = array<i32>} : memref<16x128xf32, #tpu.memory_space<vmem>>, vector<16x16xf32>,
    %c0_110 = arith.constant 0 : index
    %c0_111 = arith.constant 0 : index
    %194 = vector.load %arg11[%c0_110, %c0_111] : memref<16x128xf32, #tpu.memory_space<vmem>>, vector<16x128xf32>
    %c0_112 = arith.constant 0 : index
    %c0_113 = arith.constant 0 : index
    %195 = vector.load %arg6[%c0_112, %c0_113] : memref<128x128xf32, #tpu.memory_space<vmem>>, vector<128x128xf32>
    %cst_114 = arith.constant dense<0.000000e+00> : vector<16x128xf32>
    %196 = tpu.matmul %194, %195, %cst_114 {dimension_numbers = #tpu.dot_dimension_numbers<[1], [0], [0], [1], [0, 0, 1, 1], [], []>} : vector<16x128xf32>, vector<128x128xf32>, vector<16x128xf32> -> vector<16x128xf32>
    %c0_115 = arith.constant 0 : index
    %c0_116 = arith.constant 0 : index
    %197 = vector.load %arg7[%c0_115, %c0_116] : memref<1x128xf32, #tpu.memory_space<vmem>>, vector<1x128xf32>
    %198 = vector.broadcast %197 : vector<1x128xf32> to vector<16x128xf32>
    %199 = arith.addf %196, %198 : vector<16x128xf32>
    %c0_117 = arith.constant 0 : index
    %c0_118 = arith.constant 0 : index
    %c0_119 = arith.constant 0 : index
    %200 = vector.load %arg8[%c0_117, %c0_118, %c0_119] : memref<1x16x128xf32, #tpu.memory_space<vmem>>, vector<1x16x128xf32>
    %201 = vector.shape_cast %200 : vector<1x16x128xf32> to vector<16x128xf32>
    %202 = vector.shape_cast %199 : vector<16x128xf32> to vector<1x16x128xf32>
    tpu.vector_store %arg8[%c0_117, %c0_118, %c0_119], %202 {strides = array<i32>} : memref<1x16x128xf32, #tpu.memory_space<vmem>>, vector<1x16x128xf32>,
    return
  }
  func.func @transform_0(%arg0: i32, %arg1: i32) -> (i32, i32, i32) {
    %c0_i32 = arith.constant 0 : i32
    %c0_i32_0 = arith.constant 0 : i32
    %c0_i32_1 = arith.constant 0 : i32
    return %arg0, %c0_i32, %c0_i32_0 : i32, i32, i32
  }
  func.func @transform_1(%arg0: i32, %arg1: i32) -> (i32, i32) {
    %c0_i32 = arith.constant 0 : i32
    %c0_i32_0 = arith.constant 0 : i32
    %c0_i32_1 = arith.constant 0 : i32
    return %c0_i32, %c0_i32_0 : i32, i32
  }
  func.func @transform_2(%arg0: i32, %arg1: i32) -> (i32, i32) {
    %c0_i32 = arith.constant 0 : i32
    %c0_i32_0 = arith.constant 0 : i32
    %c0_i32_1 = arith.constant 0 : i32
    return %c0_i32, %c0_i32_0 : i32, i32
  }
  func.func @transform_3(%arg0: i32, %arg1: i32) -> (i32, i32) {
    %c0_i32 = arith.constant 0 : i32
    %c0_i32_0 = arith.constant 0 : i32
    %c0_i32_1 = arith.constant 0 : i32
    return %c0_i32, %c0_i32_0 : i32, i32
  }
  func.func @transform_4(%arg0: i32, %arg1: i32) -> (i32, i32) {
    %c0_i32 = arith.constant 0 : i32
    %c0_i32_0 = arith.constant 0 : i32
    %c0_i32_1 = arith.constant 0 : i32
    return %c0_i32, %c0_i32_0 : i32, i32
  }
  func.func @transform_5(%arg0: i32, %arg1: i32) -> (i32, i32) {
    %c0_i32 = arith.constant 0 : i32
    %c0_i32_0 = arith.constant 0 : i32
    %c0_i32_1 = arith.constant 0 : i32
    return %c0_i32, %c0_i32_0 : i32, i32
  }
  func.func @transform_6(%arg0: i32, %arg1: i32) -> (i32, i32, i32) {
    %c0_i32 = arith.constant 0 : i32
    %c0_i32_0 = arith.constant 0 : i32
    return %arg0, %arg1, %c0_i32 : i32, i32, i32
  }
}

</mosaic_0001>

<bundles_post_ra>
// kernel: tpu_custom_call.1
= control target key start
LH: loop header
LB: loop body
LE: loop exit
PB: predicated region body
PF: predicated region fallthrough
CT: control target
= control target key end

     0   :  { %s4644_s0 = inlined_call_operand.hbm [shape: f32[2,16,128], index: 0, kind: input, shape index: {}]   ;;  %s4645_s1 = inlined_call_operand.hbm [shape: f32[128,128], index: 1, kind: input, shape index: {}]   ;;  %s4646_s2 = inlined_call_operand.hbm [shape: f32[128,128], index: 2, kind: input, shape index: {}]   ;;  %s4647_s3 = inlined_call_operand.hbm [shape: f32[128,128], index: 3, kind: input, shape index: {}]   ;;  %s4648_s4 = inlined_call_operand.hbm [shape: f32[128,128], index: 4, kind: input, shape index: {}]   ;;  %s4649_s5 = inlined_call_operand.vmem [shape: f32[1,128], index: 5, kind: input, shape index: {}]   ;;  %s4650_s6 = inlined_call_operand.hbm [shape: f32[2,16,128], index: 6, kind: output, shape index: {}]  }
   0x1   :  { %4658 = sst [smem:[#allocation21_spill]] %s4650_s6 }
   0x2   :  { %11 = vsyncpa [#allocation6], 0 }
   0x3   :  { %13 = vsyncpa [#allocation6 + $0x1], 0 }
   0x4   :  { %14 = vsyncpa [#allocation9], 0 }
   0x5   :  { %15 = vsyncpa [#allocation12], 0 }
   0x6   :  { %16 = vsyncpa [#allocation7], 0 }
   0x7   :  { %18 = vsyncpa [#allocation7 + $0x1], 0  ;;  %s3897_s21 = smov 0   ;;  %s3899_s22 = smov 0  }
   0x8   :  { %s3901_s23 = smov 0   ;;  %s3903_s24 = smov 0  }
   0x9   :  { %s3905_s25 = smov 0   ;;  %s3907_s26 = smov 0  }
   0xa LB: > { %4659 = sst [smem:[#allocation19_spill]] %s3823_s21  ;;  %s2749_s27 = sadd.s32 4294967295, %s3843_s26   ;;  %s3843_s26 = sphi %s3907_s26, %s24_s26   ;;  %s3839_s25 = sphi %s3905_s25, %s4685_s25   ;;  %s3835_s24 = sphi %s3903_s24, %s4684_s24   ;;  %s3831_s23 = sphi %s3901_s23, %s4683_s23   ;;  %s3827_s22 = sphi %s3899_s22, %s4682_s22   ;;  %s3823_s21 = sphi %s3897_s21, %s4681_s21  }
   0xb   : > { %s2750_s28 = sadd.s32 4294967294, %s3843_s26   ;;  %p56_p0 = scmp.ne.s32.totalorder %s3827_s22, %s3823_s21 }
   0xc   : > { %p3931_p1 = scmp.eq.s32.totalorder %s2749_s27, 0  ;;  %p3935_p2 = scmp.eq.s32.totalorder %s2749_s27, 1 }
   0xd   : > { %p193_p3 = scmp.eq.s32.totalorder %s2750_s28, 1  ;;  %p2751_p5 = scmp.ge.s32.totalorder %s3843_s26, 1 }
   0xe   : > { %s4660_s29 = scalar_select %p3931_p1, 1, 0 }
   0xf   : > { %s4661_s30 = scalar_select %p3935_p2, 1, 0 }
  0x10   : > { %p3941_p4 = por %p3931_p1, %p56_p0  ;;  %p3946_p6 = por %p193_p3, %p56_p0 }
  0x11   : > { %p200_p7 = scmp.lt.s32.totalorder %s3843_s26, 3  ;;  %s3845_s10 = smov [#allocation8]  }
  0x12   : > { %s4662_s7 = scalar_select %p3941_p4, 1, 0 }
  0x13   : > { %s4663_s8 = scalar_select %p3946_p6, 1, 0 }
  0x14   : > { %p3951_p8 = pnand %p2751_p5, %p200_p7  ;;  %s212_s11 = sshll.u32 %s3845_s10, 4  ;;  %s3955_s11 = int_to_ptr.vmem [resolvable:$true] %s212_s11 }
  0x15   : > { %4664 = sst [smem:[#allocation20_spill]] %s4663_s8  ;;  %s3846_s13 = smov [#allocation11]  }
  0x16   : > { %s4665_s9 = scalar_select %p3951_p8, 1, 0 }
  0x17   : > { %p3453_p9 = pneg %p3951_p8  ;;  %s238_s14 = sshll.u32 %s3846_s13, 4  ;;  %s3966_s14 = int_to_ptr.vmem [resolvable:$true] %s238_s14 }
  0x18   : > { %s3847_s15 = smov [#allocation10]   ;;  %s3611_s19 = scalar_lea.hbm %s4645_s1, 2048 }
  0x19   : > { %p3962_p11 = pnand %p3453_p9, %p3931_p1  ;;  %s3968_s16 = sshll.u32 %s3847_s15, 4  ;;  %s226_s16 = int_to_ptr.vmem [resolvable:$true] %s3968_s16 }
  0x1a   : > { %p3612_p12 = scmp.ne.s32.totalorder %s4645_s1, %s3611_s19  ;;  %p3618_p5 = scmp.lt.u32.totalorder %s3611_s19, %s4645_s1 }
  0x1b   : > { %p3978_p13 = pneg %p3962_p11 }
  0x1d   : > { %p3614_p0 = pnand %p3978_p13, %p3612_p12 }
  0x1f   : > { %p3615_p3 = pneg %p3614_p0 }
  0x21   : > { %p3620_p7 = pnand %p3618_p5, %p3615_p3 }
  0x23   : > { %3623 = shalt.err (!%p3620_p7)
}
  0x24   : > { %s3624_s15 = scalar_lea.vmem %s3955_s11, 2048  ;;  %p3632_p1 = scmp.lt.s32.totalorder %s3955_s11, %s3955_s11 }
  0x25   : > { %p3625_p9 = scmp.ne.s32.totalorder %s3955_s11, %s3624_s15  ;;  %p3633_p4 = scmp.lt.s32.totalorder %s3624_s15, %s3624_s15 }
  0x27   : > { %p3627_p10 = pnand %p3625_p9, %p3978_p13  ;;  %p3634_p12 = por %p3633_p4, %p3632_p1 }
  0x29   : > { %p3628_p6 = pneg %p3627_p10 }
  0x2b   : > { %p3635_p0 = pnand %p3634_p12, %p3628_p6 }
  0x2d   : > { %3638 = shalt.err (!%p3635_p0)
}
  0x2e   : > { %s3848_s17 = smov 128   ;;  %s3849_s18 = smov 8  }
  0x2f   : > { %3456 = dma.hbm_to_vmem [thread:$0]  (!%p3962_p11), %s4645_s1, 2048, %s3955_s11, [#allocation9], %s3848_s17, %s3848_s17, %s3849_s18  }
  0x30   : > { %s3639_s13 = scalar_lea.hbm %s4647_s3, 2048 }
  0x31   : > { %p3640_p1 = scmp.ne.s32.totalorder %s4647_s3, %s3639_s13  ;;  %p3646_p10 = scmp.lt.u32.totalorder %s3639_s13, %s4647_s3 }
  0x33   : > { %p3642_p4 = pnand %p3640_p1, %p3978_p13 }
  0x35   : > { %p3643_p6 = pneg %p3642_p4 }
  0x37   : > { %p3648_p3 = pnand %p3646_p10, %p3643_p6 }
  0x39   : > { %3651 = shalt.err (!%p3648_p3)
}
  0x3a   : > { %s3652_s11 = scalar_lea.vmem %s3966_s14, 2048  ;;  %p3660_p12 = scmp.lt.s32.totalorder %s3966_s14, %s3966_s14 }
  0x3b   : > { %p3653_p5 = scmp.ne.s32.totalorder %s3966_s14, %s3652_s11  ;;  %p3661_p0 = scmp.lt.s32.totalorder %s3652_s11, %s3652_s11 }
  0x3d   : > { %p3655_p7 = pnand %p3653_p5, %p3978_p13  ;;  %p3662_p1 = por %p3661_p0, %p3660_p12 }
  0x3f   : > { %p3656_p9 = pneg %p3655_p7 }
  0x41   : > { %p3663_p4 = pnand %p3662_p1, %p3656_p9 }
  0x43   : > { %3666 = shalt.err (!%p3663_p4)
}
  0x44   : > { %3462 = dma.hbm_to_vmem [thread:$0]  (!%p3962_p11), %s4647_s3, 2048, %s3966_s14, [#allocation12], %s3848_s17, %s3848_s17, %s3849_s18  }
  0x45   : > { %s3667_s20 = scalar_lea.hbm %s4646_s2, 2048 }
  0x46   : > { %p3668_p6 = scmp.ne.s32.totalorder %s4646_s2, %s3667_s20  ;;  %p3674_p5 = scmp.lt.u32.totalorder %s3667_s20, %s4646_s2 }
  0x48   : > { %p3670_p10 = pnand %p3668_p6, %p3978_p13 }
  0x4a   : > { %p3671_p3 = pneg %p3670_p10 }
  0x4c   : > { %p3676_p7 = pnand %p3674_p5, %p3671_p3 }
  0x4e   : > { %3679 = shalt.err (!%p3676_p7)
}
  0x4f   : > { %s3680_s11 = scalar_lea.vmem %s226_s16, 2048  ;;  %p3688_p1 = scmp.lt.s32.totalorder %s226_s16, %s226_s16 }
  0x50   : > { %p3681_p9 = scmp.ne.s32.totalorder %s226_s16, %s3680_s11  ;;  %p3689_p4 = scmp.lt.s32.totalorder %s3680_s11, %s3680_s11 }
  0x52   : > { %p3683_p12 = pnand %p3681_p9, %p3978_p13  ;;  %p3690_p8 = por %p3689_p4, %p3688_p1 }
  0x54   : > { %p3684_p0 = pneg %p3683_p12 }
  0x56   : > { %p3691_p2 = pnand %p3690_p8, %p3684_p0 }
  0x58   : > { %3694 = shalt.err (!%p3691_p2)
}
  0x59   : > { %3459 = dma.hbm_to_vmem [thread:$0]  (!%p3962_p11), %s4646_s2, 2048, %s226_s16, [#allocation9], %s3848_s17, %s3848_s17, %s3849_s18  }
  0x5a   : > { %s3850_s21 = smov [#allocation13]   ;;  %s3695_s27 = scalar_lea.hbm %s4648_s4, 2048 }
  0x5b   : > { %s251_s8 = sshll.u32 %s3850_s21, 4  ;;  %p3696_p2 = scmp.ne.s32.totalorder %s4648_s4, %s3695_s27  ;;  %s252_s8 = int_to_ptr.vmem [resolvable:$true] %s251_s8 }
  0x5c   : > { %p3702_p10 = scmp.lt.u32.totalorder %s3695_s27, %s4648_s4 }
  0x5d   : > { %p3698_p8 = pnand %p3696_p2, %p3978_p13 }
  0x5f   : > { %p3699_p6 = pneg %p3698_p8 }
  0x61   : > { %p3704_p3 = pnand %p3702_p10, %p3699_p6 }
  0x63   : > { %3707 = shalt.err (!%p3704_p3)
}
  0x64   : > { %s3708_s16 = scalar_lea.vmem %s252_s8, 2048  ;;  %p3716_p12 = scmp.lt.s32.totalorder %s252_s8, %s252_s8 }
  0x65   : > { %p3709_p5 = scmp.ne.s32.totalorder %s252_s8, %s3708_s16  ;;  %p3717_p0 = scmp.lt.s32.totalorder %s3708_s16, %s3708_s16 }
  0x67   : > { %p3711_p7 = pnand %p3709_p5, %p3978_p13  ;;  %p3718_p1 = por %p3717_p0, %p3716_p12 }
  0x69   : > { %p3712_p9 = pneg %p3711_p7 }
  0x6b   : > { %p3719_p4 = pnand %p3718_p1, %p3712_p9 }
  0x6d   : > { %3722 = shalt.err (!%p3719_p4)
}
  0x6e   : > { %3465 = dma.hbm_to_vmem [thread:$0]  (!%p3962_p11), %s4648_s4, 2048, %s252_s8, [#allocation12], %s3848_s17, %s3848_s17, %s3849_s18  }
  0x6f   : > { %s36_s28 = sadd.s32 1, %s3839_s25  ;;  %s43_s12 = sadd.s32 1, %s3831_s23 }
  0x70   : > { %p38_p13 = scmp.ge.s32.totalorder %s36_s28, 2  ;;  %p50_p2 = scmp.ne.s32.totalorder %s3831_s23, %s3827_s22 }
  0x71   : > { %p51_p8 = scmp.eq.s32.totalorder %s3843_s26, 0  ;;  %p3478_p6 = scmp.lt.s32.totalorder %s3843_s26, 2 }
  0x72   : > { %s4687_s28 = smov (%p38_p13, %s36_s28), 0  ;;  %p4668_p3 = scmp.ne.s32.totalorder %s4661_s30, 0 }
  0x73   : > { %p52_p10 = por %p51_p8, %p50_p2  ;;  %s40_s19 = ssub.s32 %s3839_s25, %s4687_s28 }
  0x74   : > { %p4081_p5 = por %p4668_p3, %p50_p2  ;;  %s268_s20 = sand.u32 1, %s3831_s23  }
  0x75   : > { %p41_p7 = scmp.eq.s32.totalorder %s40_s19, 0  ;;  %s2757_s8 = sshll.u32 %s268_s20, 4 }
  0x76   : > { %s2835_s27 = sshll.u32 %s3839_s25, 8  ;;  %s272_s30 = scalar_lea.vmem [#allocation5], %s2757_s8 }
  0x77   : > { %s4090_s10 = scalar_select %p41_p7, %s3831_s23, %s43_s12  }
  0x78   : > { %s4095_s11 = scalar_lea.hbm %s4644_s0, %s2835_s27  ;;  %s279_s16 = sshll.u32 %s272_s30, 4  ;;  %s4103_s16 = int_to_ptr.vmem [resolvable:$true] %s279_s16 }
  0x79   : > { %p4099_p11 = pnand %p3478_p6, %p52_p10  ;;  %s4105_s6 = scalar_lea.sflag [#allocation6], %s268_s20 }
  0x7a   : > { %s3723_s12 = scalar_lea.hbm %s4095_s11, 256  ;;  %s3728_s27 = scalar_lea.hbm %s4644_s0, 512 }
  0x7b   : > { %p3724_p9 = scmp.ne.s32.totalorder %s4095_s11, %s3723_s12  ;;  %p3725_p12 = pneg %p4099_p11 }
  0x7c   : > { %p3729_p4 = scmp.lt.u32.totalorder %s4095_s11, %s4644_s0  ;;  %p3730_p13 = scmp.lt.u32.totalorder %s3728_s27, %s3723_s12 }
  0x7d   : > { %p3726_p0 = pnand %p3725_p12, %p3724_p9  ;;  %p3732_p8 = scmp.lt.u32.totalorder %s3723_s12, %s4095_s11 }
  0x7e   : > { %p3731_p2 = por %p3730_p13, %p3729_p4 }
  0x7f   : > { %p3727_p1 = pneg %p3726_p0 }
  0x80   : > { %p3733_p6 = por %p3732_p8, %p3731_p2 }
  0x82   : > { %p3734_p10 = pnand %p3733_p6, %p3727_p1 }
  0x84   : > { %3737 = shalt.err (!%p3734_p10)
}
  0x85   : > { %s3738_s20 = scalar_lea.vmem %s4103_s16, 256  ;;  %s3851_s30 = smov [#allocation5]  }
  0x86   : > { %p3739_p3 = scmp.ne.s32.totalorder %s4103_s16, %s3738_s20  ;;  %s3743_s19 = sshll.u32 %s3851_s30, 4  ;;  %s3744_s19 = int_to_ptr.vmem [resolvable:$false] %s3743_s19 }
  0x87   : > { %s3745_s8 = scalar_lea.vmem %s3744_s19, 512  ;;  %p3746_p0 = scmp.lt.s32.totalorder %s4103_s16, %s3744_s19 }
  0x88   : > { %p3741_p7 = pnand %p3739_p3, %p3725_p12  ;;  %p3747_p4 = scmp.lt.s32.totalorder %s3745_s8, %s3738_s20 }
  0x8a   : > { %p3742_p9 = pneg %p3741_p7  ;;  %p3748_p13 = por %p3747_p4, %p3746_p0 }
  0x8c   : > { %p3749_p2 = pnand %p3748_p13, %p3742_p9 }
  0x8e   : > { %3752 = shalt.err (!%p3749_p2)
}
  0x8f   : > { %3469 = dma.hbm_to_vmem [thread:$0]  (!%p4099_p11), %s4095_s11, 256, %s4103_s16, %s4105_s6, %s3848_s17, %s3848_s17, %s3849_s18  }
  0x90   : > { %p4671_p12 = scmp.ne.s32.totalorder %s4665_s9, 0 }
  0x91   : > { %s4139_s12 = sand.u32 (!%p4671_p12), 1, %s3827_s22   ;;  %p4672_p1 = scmp.ne.s32.totalorder (!%p4671_p12), %s4662_s7, 0 }
  0x92   : > { %291 = sbr.rel (%p4671_p12) target bundleno = 2939 (0xb7b), region = 44  ;;  %s2761_s27 = sshll.u32 (!%p4671_p12), %s4139_s12, 4 }
  0x93   : > { %s294_s13 = scalar_lea.sflag (!%p4671_p12), [#allocation6], %s4139_s12  ;;  %s4145_s14 = scalar_lea.vmem (!%p4671_p12), [#allocation5], %s2761_s27 }
  0x99   : > { %3806 = dma.done.wait (%p4672_p1), %s294_s13, 256  }
  0x9a   : > { %3808 = vsyncadd (%p4672_p1), %s294_s13, 4294967040  ;;  %p4673_p11 = scmp.ne.s32.totalorder %s4660_s29, 0 }
  0x9c   : > { %3810 = dma.done.wait (%p4673_p11), [#allocation9], 4096  }
  0x9d   : > { %3812 = vsyncadd (%p4673_p11), [#allocation9], 4294963200 }
  0x9e   : > { %3814 = dma.done.wait (%p4673_p11), [#allocation12], 4096  }
  0x9f   : > { %3816 = vsyncadd (%p4673_p11), [#allocation12], 4294963200  ;;  %v349_v0 = vld [vmem:[#allocation10] sm:$0xff]  ;;  %v350_v1 = vld [vmem:[#allocation10 + $0x8] sm:$0xff]  ;;  %vm440_vm0 = vcmask 130048   ;;  %s3852_s29 = smov 112  }
  0xa0   : > { %v351_v2 = vld [vmem:[#allocation10 + $0x10] sm:$0xff]  ;;  %v3225_v3 = vpack.c.bf16 %v350_v1, %v349_v0  ;;  %v352_v4 = vld [vmem:[#allocation10 + $0x18] sm:$0xff]  ;;  %v353_v6 = vld [vmem:[#allocation10 + $0x20] sm:$0xff]  ;;  %s3853_s7 = smov 96   ;;  %s3854_s9 = smov 80   ;;  %vm1179_vm2 = vcmask 261248  }
  0xa1   : > { %v3229_v5 = vpack.c.bf16 %v352_v4, %v351_v2  ;;  %v354_v7 = vld [vmem:[#allocation10 + $0x28] sm:$0xff]  ;;  %v4160_v9 = vld [vmem:[%s4145_s14] sm:$0xff]  ;;  %v356_v11 = vld [vmem:[#allocation10 + $0x38] sm:$0xff]  ;;  %s3855_s17 = smov 64   ;;  %s3856_s18 = smov 48   ;;  %vm1396_vm3 = vcmask 392448  }
  0xa2   : > { %3226 = vmatprep.subr.bf16.mxu0 %v3225_v3  ;;  %v3233_v8 = vpack.c.bf16 %v354_v7, %v353_v6  ;;  %v355_v10 = vld [vmem:[#allocation10 + $0x30] sm:$0xff]  ;;  %3005 = vmatprep.mubr.f32.mxu0 %v4160_v9  ;;  %v508_v12 = vld [vmem:[#allocation11] sm:$0xff]  ;;  %v509_v13 = vld [vmem:[#allocation11 + $0x8] sm:$0xff]  ;;  %s3857_s11 = smov 32   ;;  %s3858_s16 = smov 16   ;;  %vm1613_vm4 = vcmask 523648  }
  0xa3   : > { %3228 = vmatpush3.bf16.msra.mxu0 %v3225_v3  ;;  %3040 = vmatprep.mubr.f32.mxu1 %v4160_v9  ;;  %v3257_v14 = vpack.c.bf16 %v509_v13, %v508_v12  ;;  %v510_v15 = vld [vmem:[#allocation11 + $0x10] sm:$0xff]  ;;  %v511_v16 = vld [vmem:[#allocation11 + $0x18] sm:$0xff]  ;;  %v3237_v17 = vpack.c.bf16 %v356_v11, %v355_v10  ;;  %v512_v19 = vld [vmem:[#allocation11 + $0x20] sm:$0xff]  ;;  %vm1830_vm5 = vcmask 654848   ;;  %vm2047_vm6 = vcmask 786048   ;;  %s341_s6 = scalar_lea.vmem [#allocation14], %s2761_s27 }
  0xa4   : > { %3230 = vmatprep.subr.bf16.mxu0 %v3229_v5  ;;  %v3261_v18 = vpack.c.bf16 %v511_v16, %v510_v15  ;;  %v513_v20 = vld [vmem:[#allocation11 + $0x28] sm:$0xff]  ;;  %v357_v21 = vld [vmem:[#allocation10 + $0x40] sm:$0xff]  ;;  %v514_v25 = vld [vmem:[#allocation11 + $0x30] sm:$0xff]  ;;  %vm2264_vm7 = vcmask 917248   ;;  %vm2481_vm8 = vcmask 1048448   ;;  %s2602_s15 = sshll.u32 %s341_s6, 4  ;;  %s4590_s15 = int_to_ptr.vmem [resolvable:$true] %s2602_s15 }
  0xa5   : > { %v358_v22 = vld [vmem:[#allocation10 + $0x48] sm:$0xff]  ;;  %3258 = vmatprep.subr.bf16.mxu1 %v3257_v14  ;;  %v3265_v23 = vpack.c.bf16 %v513_v20, %v512_v19  ;;  %v515_v26 = vld [vmem:[#allocation11 + $0x38] sm:$0xff]  ;;  %v359_v27 = vld [vmem:[#allocation10 + $0x50] sm:$0xff]  ;;  %s2836_s19 = sshll.u32 %s3835_s24, 8  ;;  %s2587_s27 = scalar_lea.sflag [#allocation7], %s4139_s12 }
  0xa6   : > { %3260 = vmatpush3.bf16.msra.mxu1 %v3257_v14  ;;  %v3241_v24 = vpack.c.bf16 %v358_v22, %v357_v21  ;;  %v360_v28 = vld [vmem:[#allocation10 + $0x58] sm:$0xff]  ;;  %v3269_v29 = vpack.c.bf16 %v515_v26, %v514_v25  ;;  %v516_v31 = vld [vmem:[#allocation11 + $0x40] sm:$0xff]  ;;  %v517_v32 = vld [vmem:[#allocation11 + $0x48] sm:$0xff]  ;;  %s3859_s24 = smov [#allocation14]  }
  0xa7   : > { %3232 = vmatpush3.bf16.msra.mxu0 %v3229_v5  ;;  %3262 = vmatprep.subr.bf16.mxu1 %v3261_v18  ;;  %v3245_v30 = vpack.c.bf16 %v360_v28, %v359_v27  ;;  %v361_v33 = vld [vmem:[#allocation10 + $0x60] sm:$0xff]  ;;  %v362_v34 = vld [vmem:[#allocation10 + $0x68] sm:$0xff]  ;;  %v3273_v35 = vpack.c.bf16 %v517_v32, %v516_v31  ;;  %v518_v37 = vld [vmem:[#allocation11 + $0x50] sm:$0xff] }
  0xa8   : > { %3234 = vmatprep.subr.bf16.mxu0 %v3233_v8  ;;  %v3249_v36 = vpack.c.bf16 %v362_v34, %v361_v33  ;;  %v519_v38 = vld [vmem:[#allocation11 + $0x58] sm:$0xff]  ;;  %v363_v39 = vld [vmem:[#allocation10 + $0x70] sm:$0xff]  ;;  %v520_v43 = vld [vmem:[#allocation11 + $0x60] sm:$0xff] }
  0xa9   : > { %v364_v40 = vld [vmem:[#allocation10 + $0x78] sm:$0xff]  ;;  %v3277_v41 = vpack.c.bf16 %v519_v38, %v518_v37  ;;  %v521_v44 = vld [vmem:[#allocation11 + $0x68] sm:$0xff]  ;;  %v670_v45 = vld [vmem:[#allocation8] sm:$0xff] }
  0xaa   : > { %3264 = vmatpush3.bf16.msra.mxu1 %v3261_v18  ;;  %v3253_v42 = vpack.c.bf16 %v364_v40, %v363_v39  ;;  %v671_v46 = vld [vmem:[#allocation8 + $0x8] sm:$0xff]  ;;  %v3281_v47 = vpack.c.bf16 %v521_v44, %v520_v43  ;;  %v522_v49 = vld [vmem:[#allocation11 + $0x70] sm:$0xff]  ;;  %v523_v50 = vld [vmem:[#allocation11 + $0x78] sm:$0xff] }
  0xab   : > { %3236 = vmatpush3.bf16.msra.mxu0 %v3233_v8  ;;  %3266 = vmatprep.subr.bf16.mxu1 %v3265_v23  ;;  %v3289_v48 = vpack.c.bf16 %v671_v46, %v670_v45  ;;  %v672_v51 = vld [vmem:[#allocation8 + $0x10] sm:$0xff]  ;;  %v673_v52 = vld [vmem:[#allocation8 + $0x18] sm:$0xff]  ;;  %v3285_v54 = vpack.c.bf16 %v523_v50, %v522_v49  ;;  %v674_v56 = vld [vmem:[#allocation8 + $0x20] sm:$0xff] }
  0xac   : > { %3238 = vmatprep.subr.bf16.mxu0 %v3237_v17  ;;  %v348_v53 = vld [vmem:[%s4145_s14 + $0x8] sm:$0xff]  ;;  %v3293_v55 = vpack.c.bf16 %v673_v52, %v672_v51  ;;  %v676_v59 = vld [vmem:[#allocation8 + $0x30] sm:$0xff]  ;;  %v678_v62 = vld [vmem:[#allocation8 + $0x40] sm:$0xff]  ;;  %s4676_s14 = sld [smem:[#allocation21_spill]] }
  0xad   : > { %v675_v57 = vld [vmem:[#allocation8 + $0x28] sm:$0xff]  ;;  %v677_v60 = vld [vmem:[#allocation8 + $0x38] sm:$0xff]  ;;  %v680_v1 = vld [vmem:[#allocation8 + $0x50] sm:$0xff] }
  0xae   : > { %3268 = vmatpush3.bf16.msra.mxu1 %v3265_v23  ;;  %v3297_v58 = vpack.c.bf16 %v675_v57, %v674_v56  ;;  %v3301_v61 = vpack.c.bf16 %v677_v60, %v676_v59  ;;  %v679_v63 = vld [vmem:[#allocation8 + $0x48] sm:$0xff]  ;;  %v681_v2 = vld [vmem:[#allocation8 + $0x58] sm:$0xff]  ;;  %v682_v4 = vld [vmem:[#allocation8 + $0x60] sm:$0xff] }
  0xaf   : > { %3240 = vmatpush3.bf16.msra.mxu0 %v3237_v17  ;;  %3270 = vmatprep.subr.bf16.mxu1 %v3269_v29  ;;  %v3305_v0 = vpack.c.bf16 %v679_v63, %v678_v62  ;;  %v3309_v3 = vpack.c.bf16 %v681_v2, %v680_v1  ;;  %v683_v5 = vld [vmem:[#allocation8 + $0x68] sm:$0xff]  ;;  %v684_v7 = vld [vmem:[#allocation8 + $0x70] sm:$0xff]  ;;  %v685_v8 = vld [vmem:[#allocation8 + $0x78] sm:$0xff] }
  0xb0   : > { %3242 = vmatprep.subr.bf16.mxu0 %v3241_v24  ;;  %v3313_v6 = vpack.c.bf16 %v683_v5, %v682_v4  ;;  %vm4186_vm1 = vmpackc.low %vm440_vm0, %vm440_vm0 }
  0xb2   : > { %3272 = vmatpush3.bf16.msra.mxu1 %v3269_v29 }
  0xb3   : > { %3244 = vmatpush3.bf16.msra.mxu0 %v3241_v24  ;;  %3274 = vmatprep.subr.bf16.mxu1 %v3273_v35 }
  0xb4   : > { %3246 = vmatprep.subr.bf16.mxu0 %v3245_v30 }
  0xb6   : > { %3276 = vmatpush3.bf16.msra.mxu1 %v3273_v35 }
  0xb7   : > { %3248 = vmatpush3.bf16.msra.mxu0 %v3245_v30  ;;  %3278 = vmatprep.subr.bf16.mxu1 %v3277_v41 }
  0xb8   : > { %3250 = vmatprep.subr.bf16.mxu0 %v3249_v36 }
  0xba   : > { %3280 = vmatpush3.bf16.msra.mxu1 %v3277_v41 }
  0xbb   : > { %3252 = vmatpush3.bf16.msra.mxu0 %v3249_v36  ;;  %3282 = vmatprep.subr.bf16.mxu1 %v3281_v47 }
  0xbc   : > { %3254 = vmatprep.subr.bf16.mxu0 %v3253_v42 }
  0xbe   : > { %3284 = vmatpush3.bf16.msra.mxu1 %v3281_v47 }
  0xbf   : > { %3256 = vmatpush3.bf16.msra.mxu0 %v3253_v42  ;;  %3286 = vmatprep.subr.bf16.mxu1 %v3285_v54 }
  0xc0   : > { %3290 = vmatprep.subr.bf16.mxu0 %v3289_v48 }
  0xc2   : > { %3006 = vmatmul.mubr.f32.vlgmr.msra.gmra.mrb[0].mxu0 %v348_v53  ;;  %3288 = vmatpush3.bf16.msra.mxu1 %v3285_v54 }
  0xc3   : > { %3292 = vmatpush3.bf16.msra.mxu0 %v3289_v48  ;;  %3075 = vmatprep.mubr.f32.mxu0 %v4160_v9  ;;  %v3317_v9 = vpack.c.bf16 %v685_v8, %v684_v7 }
  0xc4   : > { %3294 = vmatprep.subr.bf16.mxu0 %v3293_v55 }
  0xc5   : > { %3041 = vmatmul.mubr.f32.vlgmr.msra.gmra.mrb[0].mxu1 %v348_v53 }
  0xc7   : > { %3296 = vmatpush3.bf16.msra.mxu0 %v3293_v55 }
  0xc8   : > { %3298 = vmatprep.subr.bf16.mxu0 %v3297_v58 }
  0xcb   : > { %3300 = vmatpush3.bf16.msra.mxu0 %v3297_v58 }
  0xcc   : > { %3302 = vmatprep.subr.bf16.mxu0 %v3301_v61 }
  0xcf   : > { %3304 = vmatpush3.bf16.msra.mxu0 %v3301_v61 }
  0xd0   : > { %3306 = vmatprep.subr.bf16.mxu0 %v3305_v0 }
  0xd3   : > { %3308 = vmatpush3.bf16.msra.mxu0 %v3305_v0 }
  0xd4   : > { %3310 = vmatprep.subr.bf16.mxu0 %v3309_v3 }
  0xd7   : > { %3312 = vmatpush3.bf16.msra.mxu0 %v3309_v3 }
  0xd8   : > { %3314 = vmatprep.subr.bf16.mxu0 %v3313_v6 }
  0xdb   : > { %3316 = vmatpush3.bf16.msra.mxu0 %v3313_v6 }
  0xdc   : > { %3318 = vmatprep.subr.bf16.mxu0 %v3317_v9 }
  0xdf   : > { %3320 = vmatpush3.bf16.msra.mxu0 %v3317_v9 }
  0xe2   : > { %3076 = vmatmul.mubr.f32.vlgmr.msra.gmra.mrb[2].mxu0 %v348_v53 }
 0x195   : > { %v4166_v10 = vpop.f32.mrb[0].mxu0 }
 0x196   : > { %442 = vst.msk [vmem:[#allocation2 + $0x8] sm:$0xff] %vm440_vm0, %v4166_v10  ;;  %v4170_v11 = vpop.f32.mrb[1].mxu0 }
 0x197   : > { %441 = vst.msk [vmem:[#allocation2] sm:$0xff] %vm440_vm0, %v4170_v11  ;;  %445 = vrot.lane.b32.xlu1 %v4170_v11, %s3852_s29 }
 0x198   : > { %v4178_v12 = vpop.f32.mrb[0].mxu1 }
 0x199   : > { %600 = vst.msk [vmem:[#allocation3 + $0x8] sm:$0xff] %vm440_vm0, %v4178_v12  ;;  %v4182_v14 = vpop.f32.mrb[1].mxu1 }
 0x19a   : > { %599 = vst.msk [vmem:[#allocation3] sm:$0xff] %vm440_vm0, %v4182_v14 }
 0x19b   : > { %447 = vrot.lane.b32.xlu1 %v4166_v10, %s3852_s29 }
 0x19d   : > { %v762_v13 = vld [vmem:[#allocation2 + $0x8] sm:$0xff] }
 0x19e   : > { %v761_v15 = vld [vmem:[#allocation2] sm:$0xff] }
 0x19f   : > { %v3321_v17 = vpack.c.bf16 %v762_v13, %v761_v15 }
 0x1a0   : > { %v4196_v18 = vld [vmem:[#allocation3 + $0x8] sm:$0xff] }
 0x1a1   : > { %3323 = vmatprep.subr.msk.bf16.mxu1 %vm4186_vm1, %v3321_v17  ;;  %v4198_v19 = vld [vmem:[#allocation3] sm:$0xff] }
 0x1a2   : > { %3326 = vmatpush3.bf16.xpose.msk.msra.mxu1 %vm4186_vm1, %v3321_v17  ;;  %v3327_v20 = vpack.c.bf16 %v4196_v18, %v4198_v19 }
 0x1a4   : > { %3328 = vmatprep.subr.bf16.mxu1 %v3327_v20 }
 0x1b5   : > { %v4202_v21 = vpop.f32.mrb[2].mxu0 }
 0x1b6   : > { %973 = vrot.lane.b32.xlu1 %v4202_v21, %s3852_s29  ;;  %v4206_v22 = vpop.f32.mrb[3].mxu0 }
 0x1b7   : > { %3082 = vmatprep.mubr.msk.f32.mxu1 %vm440_vm0, %v4206_v22 }
 0x1b8   : > { %3083 = vmatmul.mubr.msk.f32.vlgmr.msra.gmra.mrb[2].mxu1 %vm440_vm0, %v4202_v21 }
 0x1b9   : > { %3330 = vmatpush3.bf16.msra.mxu1 %v3327_v20 }
 0x1ba   : > { %603 = vrot.lane.b32.xlu1 %v4182_v14, %s3852_s29 }
 0x1be   : > { %454 = vrot.lane.b32.xlu1 %v4170_v11, %s3853_s7 }
 0x1c2   : > { %456 = vrot.lane.b32.xlu1 %v4166_v10, %s3853_s7 }
 0x1c6   : > { %463 = vrot.lane.b32.xlu1 %v4170_v11, %s3854_s9 }
 0x1ca   : > { %465 = vrot.lane.b32.xlu1 %v4166_v10, %s3854_s9 }
 0x209   : > { %v446_v23 = vpop.permute.xlu1 %445 }
 0x20a   : > { %452 = vst.msk [vmem:[#allocation2 + $0x10] sm:$0xff] %vm440_vm0, %v446_v23 }
 0x20d   : > { %v448_v24 = vpop.permute.xlu1 %447 }
 0x20e   : > { %453 = vst.msk [vmem:[#allocation2 + $0x18] sm:$0xff] %vm440_vm0, %v448_v24 }
 0x211   : > { %v966_v25 = vld [vmem:[#allocation2 + $0x10] sm:$0xff] }
 0x215   : > { %v967_v26 = vld [vmem:[#allocation2 + $0x18] sm:$0xff] }
 0x216   : > { %v3331_v27 = vpack.c.bf16 %v967_v26, %v966_v25 }
 0x218   : > { %3333 = vmatprep.subr.msk.bf16.mxu1 %vm4186_vm1, %v3331_v27 }
 0x228   : > { %v974_v28 = vpop.permute.xlu1 %973 }
 0x22c   : > { %v604_v29 = vpop.permute.xlu1 %603 }
 0x22d   : > { %610 = vst.msk [vmem:[#allocation3 + $0x10] sm:$0xff] %vm440_vm0, %v604_v29 }
 0x230   : > { %v455_v30 = vpop.permute.xlu1 %454 }
 0x231   : > { %461 = vst.msk [vmem:[#allocation2 + $0x20] sm:$0xff] %vm440_vm0, %v455_v30 }
 0x234   : > { %v457_v31 = vpop.permute.xlu1 %456  ;;  %v4282_v0 = vld [vmem:[#allocation3 + $0x10] sm:$0xff] }
 0x235   : > { %462 = vst.msk [vmem:[#allocation2 + $0x28] sm:$0xff] %vm440_vm0, %v457_v31 }
 0x238   : > { %v464_v32 = vpop.permute.xlu1 %463  ;;  %v1183_v5 = vld [vmem:[#allocation2 + $0x20] sm:$0xff] }
 0x239   : > { %470 = vst.msk [vmem:[#allocation2 + $0x30] sm:$0xff] %vm440_vm0, %v464_v32 }
 0x23c   : > { %v466_v33 = vpop.permute.xlu1 %465  ;;  %v1184_v2 = vld [vmem:[#allocation2 + $0x28] sm:$0xff] }
 0x23d   : > { %471 = vst.msk [vmem:[#allocation2 + $0x38] sm:$0xff] %vm440_vm0, %v466_v33  ;;  %v3341_v6 = vpack.c.bf16 %v1184_v2, %v1183_v5 }
 0x240   : > { %v1400_v23 = vld [vmem:[#allocation2 + $0x30] sm:$0xff] }
 0x244   : > { %v1401_v20 = vld [vmem:[#allocation2 + $0x38] sm:$0xff] }
 0x245   : > { %v3351_v25 = vpack.c.bf16 %v1401_v20, %v1400_v23 }
 0x28b   : > { %v3084_v34 = vpop.f32.mrb[2].mxu1 }
 0x28c   : > { %v844_v35 = vpop.f32.mrb[3].mxu1  ;;  %v856_v37 = vsel %vm440_vm0, %v3084_v34, -inf }
 0x28d   : > { %v853_v36 = vsel %vm440_vm0, %v844_v35, -inf }
 0x28e   : > { %854 = vmax.xlane.f32.xlu0 %v853_v36 }
 0x292   : > { %857 = vmax.xlane.f32.xlu0 %v856_v37 }
 0x2a8   : > { %971 = vrot.lane.b32.xlu0 %v4206_v22, %s3852_s29 }
 0x31b   : > { %v855_v38 = vpop.xlane.xlu0 %854 }
 0x31c   : > { %v859_v39 = vsub.f32 %v844_v35, %v855_v38 }
 0x31e   : > { %v861_v40 = vmul.f32 1.442695, %v859_v39 }
 0x31f   : > { %v858_v41 = vpop.xlane.xlu0 %857 }
 0x320   : > { %3547 = vpow2.f32 %v861_v40  ;;  %v860_v42 = vsub.f32 %v3084_v34, %v858_v41 }
 0x322   : > { %v863_v43 = vmul.f32 1.442695, %v860_v42 }
 0x323   : > { %v972_v46 = vpop.permute.xlu0 %971 }
 0x324   : > { %3549 = vpow2.f32 %v863_v43 }
 0x32a   : > { %v4235_v44 = vpop.eup %3547 }
 0x32b   : > { %3089 = vmatprep.mubr.msk.f32.mxu1 %vm440_vm0, %v4235_v44 }
 0x32e   : > { %v4239_v45 = vpop.eup %3549 }
 0x32f   : > { %3090 = vmatmul.mubr.msk.f32.vlgmr.msra.gmra.mrb[4].mxu1 %vm440_vm0, %v4239_v45 }
 0x330   : > { %3336 = vmatpush3.bf16.xpose.msk.msra.mxu1 %vm4186_vm1, %v3331_v27  ;;  %3096 = vmatprep.mubr.msk.f32.mxu1 %vm440_vm0, %v972_v46 }
 0x337   : > { %3097 = vmatmul.mubr.msk.f32.vlgmr.msra.gmra.mrb[6].mxu1 %vm440_vm0, %v974_v28 }
 0x402   : > { %v4247_v47 = vpop.f32.mrb[4].mxu1 }
 0x403   : > { %v4249_v48 = vpop.f32.mrb[5].mxu1 }
 0x40a   : > { %v3098_v49 = vpop.f32.mrb[6].mxu1 }
 0x40b   : > { %v1051_v50 = vpop.f32.mrb[7].mxu1  ;;  %v1063_v51 = vsel %vm440_vm0, %v3098_v49, -inf }
 0x40c   : > { %1064 = vmax.xlane.f32.xlu0 %v1063_v51  ;;  %v1060_v52 = vsel %vm440_vm0, %v1051_v50, -inf }
 0x40d   : > { %1061 = vmax.xlane.f32.xlu1 %v1060_v52 }
 0x41e   : > { %472 = vrot.lane.b32.xlu1 %v4170_v11, %s3855_s17 }
 0x422   : > { %605 = vrot.lane.b32.xlu0 %v4178_v12, %s3852_s29  ;;  %1188 = vrot.lane.b32.xlu1 %v4206_v22, %s3853_s7 }
 0x426   : > { %474 = vrot.lane.b32.xlu0 %v4166_v10, %s3855_s17  ;;  %1405 = vrot.lane.b32.xlu1 %v4206_v22, %s3854_s9 }
 0x42a   : > { %1190 = vrot.lane.b32.xlu0 %v4202_v21, %s3853_s7  ;;  %1622 = vrot.lane.b32.xlu1 %v4206_v22, %s3855_s17 }
 0x42e   : > { %1407 = vrot.lane.b32.xlu0 %v4202_v21, %s3854_s9  ;;  %632 = vrot.lane.b32.xlu1 %v4178_v12, %s3855_s17 }
 0x432   : > { %1624 = vrot.lane.b32.xlu0 %v4202_v21, %s3855_s17  ;;  %481 = vrot.lane.b32.xlu1 %v4170_v11, %s3856_s18 }
 0x436   : > { %630 = vrot.lane.b32.xlu0 %v4182_v14, %s3855_s17 }
 0x43a   : > { %483 = vrot.lane.b32.xlu0 %v4166_v10, %s3856_s18 }
 0x499   : > { %v1065_v53 = vpop.xlane.xlu0 %1064 }
 0x49a   : > { %v1067_v54 = vsub.f32 %v3098_v49, %v1065_v53  ;;  %v1062_v55 = vpop.xlane.xlu1 %1061 }
 0x49b   : > { %v1066_v56 = vsub.f32 %v1051_v50, %v1062_v55 }
 0x49c   : > { %v1070_v57 = vmul.f32 1.442695, %v1067_v54 }
 0x49d   : > { %v1068_v58 = vmul.f32 1.442695, %v1066_v56  ;;  %v606_v59 = vpop.permute.xlu0 %605 }
 0x49e   : > { %611 = vst.msk [vmem:[#allocation3 + $0x18] sm:$0xff] %vm440_vm0, %v606_v59  ;;  %v473_v60 = vpop.permute.xlu1 %472 }
 0x49f   : > { %3551 = vpow2.f32 %v1068_v58  ;;  %479 = vst.msk [vmem:[#allocation2 + $0x40] sm:$0xff] %vm440_vm0, %v473_v60 }
 0x4a0   : > { %3553 = vpow2.f32 %v1070_v57 }
 0x4a1   : > { %v475_v61 = vpop.permute.xlu0 %474 }
 0x4a2   : > { %480 = vst.msk [vmem:[#allocation2 + $0x48] sm:$0xff] %vm440_vm0, %v475_v61  ;;  %v1189_v62 = vpop.permute.xlu1 %1188 }
 0x4a5   : > { %v1191_v63 = vpop.permute.xlu0 %1190  ;;  %v4284_v1 = vld [vmem:[#allocation3 + $0x18] sm:$0xff] }
 0x4a6   : > { %v1406_v3 = vpop.permute.xlu1 %1405  ;;  %v3337_v4 = vpack.c.bf16 %v4284_v1, %v4282_v0  ;;  %v1617_v29 = vld [vmem:[#allocation2 + $0x40] sm:$0xff] }
 0x4a8   : > { %3338 = vmatprep.subr.bf16.mxu1 %v3337_v4 }
 0x4a9   : > { %v4288_v7 = vpop.eup %3551  ;;  %3340 = vmatpush3.bf16.msra.mxu1 %v3337_v4  ;;  %v1408_v8 = vpop.permute.xlu0 %1407  ;;  %v1618_v28 = vld [vmem:[#allocation2 + $0x48] sm:$0xff] }
 0x4aa   : > { %3103 = vmatprep.mubr.msk.f32.mxu1 %vm440_vm0, %v4288_v7  ;;  %3343 = vmatprep.subr.msk.bf16.mxu1 %vm4186_vm1, %v3341_v6  ;;  %v1623_v9 = vpop.permute.xlu1 %1622  ;;  %v4294_v13 = vpop.eup %3553  ;;  %v3361_v30 = vpack.c.bf16 %v1618_v28, %v1617_v29 }
 0x4ac   : > { %3104 = vmatmul.mubr.msk.f32.vlgmr.msra.gmra.mrb[8].mxu1 %vm440_vm0, %v4294_v13 }
 0x4ad   : > { %v1625_v15 = vpop.permute.xlu0 %1624  ;;  %3110 = vmatprep.mubr.msk.f32.mxu1 %vm440_vm0, %v1189_v62 }
 0x4ae   : > { %v633_v17 = vpop.permute.xlu1 %632 }
 0x4af   : > { %638 = vst.msk [vmem:[#allocation3 + $0x48] sm:$0xff] %vm440_vm0, %v633_v17 }
 0x4b1   : > { %v631_v24 = vpop.permute.xlu0 %630 }
 0x4b2   : > { %637 = vst.msk [vmem:[#allocation3 + $0x40] sm:$0xff] %vm440_vm0, %v631_v24  ;;  %3346 = vmatpush3.bf16.xpose.msk.msra.mxu1 %vm4186_vm1, %v3341_v6  ;;  %v482_v26 = vpop.permute.xlu1 %481 }
 0x4b3   : > { %488 = vst.msk [vmem:[#allocation2 + $0x50] sm:$0xff] %vm440_vm0, %v482_v26  ;;  %3353 = vmatprep.subr.msk.bf16.mxu1 %vm4186_vm1, %v3351_v25 }
 0x4b5   : > { %v484_v27 = vpop.permute.xlu0 %483 }
 0x4b6   : > { %489 = vst.msk [vmem:[#allocation2 + $0x58] sm:$0xff] %vm440_vm0, %v484_v27  ;;  %v4315_v32 = vld [vmem:[#allocation3 + $0x48] sm:$0xff] }
 0x4b9   : > { %3111 = vmatmul.mubr.msk.f32.vlgmr.msra.gmra.mrb[10].mxu1 %vm440_vm0, %v1191_v63  ;;  %v4313_v31 = vld [vmem:[#allocation3 + $0x40] sm:$0xff] }
 0x4ba   : > { %3356 = vmatpush3.bf16.xpose.msk.msra.mxu1 %vm4186_vm1, %v3351_v25  ;;  %3124 = vmatprep.mubr.msk.f32.mxu1 %vm440_vm0, %v1406_v3  ;;  %v3367_v33 = vpack.c.bf16 %v4315_v32, %v4313_v31  ;;  %v1834_v35 = vld [vmem:[#allocation2 + $0x50] sm:$0xff] }
 0x4bb   : > { %3363 = vmatprep.subr.msk.bf16.mxu1 %vm4186_vm1, %v3361_v30 }
 0x4bd   : > { %v1835_v34 = vld [vmem:[#allocation2 + $0x58] sm:$0xff] }
 0x4be   : > { %v3371_v36 = vpack.c.bf16 %v1835_v34, %v1834_v35 }
 0x4c1   : > { %3125 = vmatmul.mubr.msk.f32.vlgmr.msra.gmra.mrb[12].mxu1 %vm440_vm0, %v1408_v8 }
 0x4c2   : > { %3366 = vmatpush3.bf16.xpose.msk.msra.mxu1 %vm4186_vm1, %v3361_v30  ;;  %3138 = vmatprep.mubr.msk.f32.mxu1 %vm440_vm0, %v1623_v9 }
 0x4c3   : > { %3368 = vmatprep.subr.bf16.mxu1 %v3367_v33 }
 0x4c9   : > { %3139 = vmatmul.mubr.msk.f32.vlgmr.msra.gmra.mrb[14].mxu1 %vm440_vm0, %v1625_v15 }
 0x4ca   : > { %3370 = vmatpush3.bf16.msra.mxu1 %v3367_v33 }
 0x4cb   : > { %3373 = vmatprep.subr.msk.bf16.mxu1 %vm4186_vm1, %v3371_v36 }
 0x57f   : > { %v4326_v37 = vpop.f32.mrb[8].mxu1 }
 0x580   : > { %v4328_v38 = vpop.f32.mrb[9].mxu1 }
 0x58c   : > { %v4330_v39 = vpop.f32.mrb[10].mxu1 }
 0x58d   : > { %v4332_v40 = vpop.f32.mrb[11].mxu1  ;;  %v1280_v33 = vsel %vm440_vm0, %v4330_v39, -inf }
 0x58e   : > { %v1277_v30 = vsel %vm440_vm0, %v4332_v40, -inf }
 0x594   : > { %v4334_v41 = vpop.f32.mrb[12].mxu1 }
 0x595   : > { %v4336_v42 = vpop.f32.mrb[13].mxu1  ;;  %v1497_v34 = vsel %vm440_vm0, %v4334_v41, -inf }
 0x59c   : > { %v3140_v43 = vpop.f32.mrb[14].mxu1 }
 0x59d   : > { %v1702_v46 = vpop.f32.mrb[15].mxu1  ;;  %v1714_v49 = vsel %vm440_vm0, %v3140_v43, -inf }
 0x59e   : > { %1715 = vmax.xlane.f32.xlu0 %v1714_v49  ;;  %v1711_v50 = vsel %vm440_vm0, %v1702_v46, -inf }
 0x59f   : > { %1712 = vmax.xlane.f32.xlu1 %v1711_v50 }
 0x5b0   : > { %490 = vrot.lane.b32.xlu1 %v4170_v11, %s3857_s11 }
 0x5b4   : > { %492 = vrot.lane.b32.xlu0 %v4166_v10, %s3857_s11  ;;  %1839 = vrot.lane.b32.xlu1 %v4206_v22, %s3856_s18 }
 0x5b8   : > { %1841 = vrot.lane.b32.xlu0 %v4202_v21, %s3856_s18  ;;  %2056 = vrot.lane.b32.xlu1 %v4206_v22, %s3857_s11 }
 0x5bc   : > { %2058 = vrot.lane.b32.xlu0 %v4202_v21, %s3857_s11  ;;  %650 = vrot.lane.b32.xlu1 %v4178_v12, %s3857_s11 }
 0x5c0   : > { %648 = vrot.lane.b32.xlu0 %v4182_v14, %s3857_s11  ;;  %499 = vrot.lane.b32.xlu1 %v4170_v11, %s3858_s16 }
 0x62b   : > { %v1716_v51 = vpop.xlane.xlu0 %1715 }
 0x62c   : > { %v1718_v52 = vsub.f32 %v3140_v43, %v1716_v51  ;;  %v1713_v53 = vpop.xlane.xlu1 %1712 }
 0x62d   : > { %v1717_v54 = vsub.f32 %v1702_v46, %v1713_v53 }
 0x62e   : > { %v1721_v55 = vmul.f32 1.442695, %v1718_v52 }
 0x62f   : > { %v1719_v56 = vmul.f32 1.442695, %v1717_v54  ;;  %v493_v57 = vpop.permute.xlu0 %492 }
 0x630   : > { %498 = vst.msk [vmem:[#allocation2 + $0x68] sm:$0xff] %vm440_vm0, %v493_v57  ;;  %v491_v58 = vpop.permute.xlu1 %490 }
 0x631   : > { %3555 = vpow2.f32 %v1719_v56  ;;  %497 = vst.msk [vmem:[#allocation2 + $0x60] sm:$0xff] %vm440_vm0, %v491_v58 }
 0x632   : > { %3557 = vpow2.f32 %v1721_v55 }
 0x633   : > { %v1842_v59 = vpop.permute.xlu0 %1841 }
 0x634   : > { %v1840_v60 = vpop.permute.xlu1 %1839 }
 0x637   : > { %v2059_v61 = vpop.permute.xlu0 %2058  ;;  %v2052_v11 = vld [vmem:[#allocation2 + $0x68] sm:$0xff] }
 0x638   : > { %v2057_v62 = vpop.permute.xlu1 %2056  ;;  %v2051_v63 = vld [vmem:[#allocation2 + $0x60] sm:$0xff] }
 0x639   : > { %v3381_v6 = vpack.c.bf16 %v2052_v11, %v2051_v63 }
 0x63b   : > { %v4360_v2 = vpop.eup %3555  ;;  %v649_v3 = vpop.permute.xlu0 %648 }
 0x63c   : > { %v4362_v4 = vpop.eup %3557  ;;  %655 = vst.msk [vmem:[#allocation3 + $0x60] sm:$0xff] %vm440_vm0, %v649_v3  ;;  %3145 = vmatprep.mubr.msk.f32.mxu1 %vm440_vm0, %v4360_v2  ;;  %v651_v5 = vpop.permute.xlu1 %650 }
 0x63d   : > { %656 = vst.msk [vmem:[#allocation3 + $0x68] sm:$0xff] %vm440_vm0, %v651_v5  ;;  %3146 = vmatmul.mubr.msk.f32.vlgmr.msra.gmra.mrb[16].mxu1 %vm440_vm0, %v4362_v4 }
 0x63e   : > { %3376 = vmatpush3.bf16.xpose.msk.msra.mxu1 %vm4186_vm1, %v3371_v36  ;;  %3152 = vmatprep.mubr.msk.f32.mxu1 %vm440_vm0, %v1840_v60 }
 0x63f   : > { %3383 = vmatprep.subr.msk.bf16.mxu1 %vm4186_vm1, %v3381_v6 }
 0x640   : > { %v500_v8 = vpop.permute.xlu1 %499 }
 0x641   : > { %506 = vst.msk [vmem:[#allocation2 + $0x70] sm:$0xff] %vm440_vm0, %v500_v8 }
 0x643   : > { %v4376_v9 = vld [vmem:[#allocation3 + $0x60] sm:$0xff] }
 0x644   : > { %v4378_v15 = vld [vmem:[#allocation3 + $0x68] sm:$0xff] }
 0x645   : > { %3153 = vmatmul.mubr.msk.f32.vlgmr.msra.gmra.mrb[18].mxu1 %vm440_vm0, %v1842_v59  ;;  %v3387_v17 = vpack.c.bf16 %v4378_v15, %v4376_v9 }
 0x646   : > { %3386 = vmatpush3.bf16.xpose.msk.msra.mxu1 %vm4186_vm1, %v3381_v6  ;;  %3166 = vmatprep.mubr.msk.f32.mxu1 %vm440_vm0, %v2057_v62 }
 0x647   : > { %3388 = vmatprep.subr.bf16.mxu1 %v3387_v17 }
 0x648   : > { %v2268_v52 = vld [vmem:[#allocation2 + $0x70] sm:$0xff] }
 0x64d   : > { %3167 = vmatmul.mubr.msk.f32.vlgmr.msra.gmra.mrb[20].mxu1 %vm440_vm0, %v2059_v61 }
 0x64e   : > { %3390 = vmatpush3.bf16.msra.mxu1 %v3387_v17 }
 0x710   : > { %v4387_v20 = vpop.f32.mrb[16].mxu1 }
 0x711   : > { %v4389_v23 = vpop.f32.mrb[17].mxu1 }
 0x718   : > { %v4391_v24 = vpop.f32.mrb[18].mxu1 }
 0x719   : > { %v4393_v25 = vpop.f32.mrb[19].mxu1 }
 0x720   : > { %v3168_v26 = vpop.f32.mrb[20].mxu1 }
 0x721   : > { %v2136_v27 = vpop.f32.mrb[21].mxu1  ;;  %v2148_v28 = vsel %vm440_vm0, %v3168_v26, -inf }
 0x722   : > { %2149 = vmax.xlane.f32.xlu0 %v2148_v28  ;;  %v2145_v29 = vsel %vm440_vm0, %v2136_v27, -inf }
 0x723   : > { %2146 = vmax.xlane.f32.xlu1 %v2145_v29 }
 0x734   : > { %2273 = vrot.lane.b32.xlu1 %v4206_v22, %s3858_s16  ;;  %v1494_v22 = vsel %vm440_vm0, %v4336_v42, -inf }
 0x738   : > { %501 = vrot.lane.b32.xlu0 %v4166_v10, %s3858_s16  ;;  %v1931_v10 = vsel %vm440_vm0, %v4391_v24, -inf }
 0x73c   : > { %2275 = vrot.lane.b32.xlu0 %v4202_v21, %s3858_s16  ;;  %v1928_v21 = vsel %vm440_vm0, %v4393_v25, -inf }
 0x758   : > { %1278 = vmax.xlane.f32.xlu1 %v1277_v30 }
 0x75b   : > { %1281 = vmax.xlane.f32.xlu0 %v1280_v33 }
 0x75c   : > { %1498 = vmax.xlane.f32.xlu1 %v1497_v34 }
 0x75f   : > { %1495 = vmax.xlane.f32.xlu0 %v1494_v22 }
 0x760   : > { %1932 = vmax.xlane.f32.xlu1 %v1931_v10 }
 0x763   : > { %1929 = vmax.xlane.f32.xlu0 %v1928_v21 }
 0x771   : > { %614 = vrot.lane.b32.xlu1 %v4178_v12, %s3853_s7 }
 0x775   : > { %621 = vrot.lane.b32.xlu1 %v4182_v14, %s3854_s9 }
 0x779   : > { %612 = vrot.lane.b32.xlu0 %v4182_v14, %s3853_s7  ;;  %639 = vrot.lane.b32.xlu1 %v4182_v14, %s3856_s18 }
 0x77d   : > { %623 = vrot.lane.b32.xlu0 %v4178_v12, %s3854_s9 }
 0x781   : > { %641 = vrot.lane.b32.xlu0 %v4178_v12, %s3856_s18 }
 0x7af   : > { %v2150_v35 = vpop.xlane.xlu0 %2149 }
 0x7b0   : > { %v2152_v36 = vsub.f32 %v3168_v26, %v2150_v35  ;;  %v2147_v43 = vpop.xlane.xlu1 %2146 }
 0x7b1   : > { %v2151_v46 = vsub.f32 %v2136_v27, %v2147_v43 }
 0x7b2   : > { %v2155_v49 = vmul.f32 1.442695, %v2152_v36 }
 0x7b3   : > { %v2153_v50 = vmul.f32 1.442695, %v2151_v46  ;;  %v502_v51 = vpop.permute.xlu0 %501 }
 0x7b4   : > { %507 = vst.msk [vmem:[#allocation2 + $0x78] sm:$0xff] %vm440_vm0, %v502_v51  ;;  %v2274_v57 = vpop.permute.xlu1 %2273 }
 0x7b5   : > { %3559 = vpow2.f32 %v2153_v50 }
 0x7b6   : > { %3561 = vpow2.f32 %v2155_v49 }
 0x7b7   : > { %v2276_v58 = vpop.permute.xlu0 %2275 }
 0x7bb   : > { %v2269_v53 = vld [vmem:[#allocation2 + $0x78] sm:$0xff] }
 0x7bc   : > { %v3391_v54 = vpack.c.bf16 %v2269_v53, %v2268_v52 }
 0x7be   : > { %3393 = vmatprep.subr.msk.bf16.mxu1 %vm4186_vm1, %v3391_v54 }
 0x7bf   : > { %v4430_v55 = vpop.eup %3559 }
 0x7c0   : > { %v4432_v56 = vpop.eup %3561  ;;  %3173 = vmatprep.mubr.msk.f32.mxu1 %vm440_vm0, %v4430_v55 }
 0x7c1   : > { %3174 = vmatmul.mubr.msk.f32.vlgmr.msra.gmra.mrb[22].mxu1 %vm440_vm0, %v4432_v56 }
 0x7c2   : > { %3396 = vmatpush3.bf16.xpose.msk.msra.mxu1 %vm4186_vm1, %v3391_v54  ;;  %3180 = vmatprep.mubr.msk.f32.mxu1 %vm440_vm0, %v2274_v57 }
 0x7c9   : > { %3181 = vmatmul.mubr.msk.f32.vlgmr.msra.gmra.mrb[24].mxu1 %vm440_vm0, %v2276_v58 }
 0x7e5   : > { %v1279_v59 = vpop.xlane.xlu1 %1278 }
 0x7e6   : > { %v1283_v60 = vsub.f32 %v4332_v40, %v1279_v59 }
 0x7e8   : > { %v1285_v61 = vmul.f32 1.442695, %v1283_v60  ;;  %v1282_v62 = vpop.xlane.xlu0 %1281 }
 0x7e9   : > { %v1499_v63 = vpop.xlane.xlu1 %1498  ;;  %v1284_v5 = vsub.f32 %v4330_v39, %v1282_v62 }
 0x7ea   : > { %3563 = vpow2.f32 %v1285_v61  ;;  %v1501_v27 = vsub.f32 %v4334_v41, %v1499_v63 }
 0x7eb   : > { %v1287_v26 = vmul.f32 1.442695, %v1284_v5 }
 0x7ec   : > { %v1496_v11 = vpop.xlane.xlu0 %1495 }
 0x7ed   : > { %v1933_v3 = vpop.xlane.xlu1 %1932  ;;  %v1500_v16 = vsub.f32 %v4336_v42, %v1496_v11  ;;  %3565 = vpow2.f32 %v1287_v26  ;;  %v1504_v42 = vmul.f32 1.442695, %v1501_v27  ;;  %v1072_v11 = vsel %vm440_vm0, %v4288_v7, 0.0 }
 0x7ee   : > { %v1935_v30 = vsub.f32 %v4391_v24, %v1933_v3  ;;  %v1075_v3 = vsel %vm440_vm0, %v4294_v13, 0.0  ;;  %v1726_v26 = vsel %vm440_vm0, %v4362_v4, 0.0  ;;  %v2157_v4 = vsel %vm440_vm0, %v4430_v55, 0.0 }
 0x7ef   : > { %v1502_v28 = vmul.f32 1.442695, %v1500_v16 }
 0x7f0   : > { %v1930_v6 = vpop.xlane.xlu0 %1929 }
 0x7f1   : > { %v615_v8 = vpop.permute.xlu1 %614  ;;  %v1934_v29 = vsub.f32 %v4393_v25, %v1930_v6  ;;  %3567 = vpow2.f32 %v1502_v28  ;;  %v1938_v25 = vmul.f32 1.442695, %v1935_v30 }
 0x7f2   : > { %620 = vst.msk [vmem:[#allocation3 + $0x28] sm:$0xff] %vm440_vm0, %v615_v8  ;;  %3569 = vpow2.f32 %v1504_v42 }
 0x7f3   : > { %v1936_v34 = vmul.f32 1.442695, %v1934_v29 }
 0x7f4   : > { %v4446_v17 = vpop.eup %3563  ;;  %v613_v40 = vpop.permute.xlu0 %612 }
 0x7f5   : > { %619 = vst.msk [vmem:[#allocation3 + $0x20] sm:$0xff] %vm440_vm0, %v613_v40  ;;  %3117 = vmatprep.mubr.msk.f32.mxu0 %vm440_vm0, %v4446_v17  ;;  %v622_v39 = vpop.permute.xlu1 %621  ;;  %3571 = vpow2.f32 %v1936_v34  ;;  %v1289_v16 = vsel %vm440_vm0, %v4446_v17, 0.0  ;;  %v1723_v17 = vsel %vm440_vm0, %v4360_v2, 0.0 }
 0x7f6   : > { %628 = vst.msk [vmem:[#allocation3 + $0x30] sm:$0xff] %vm440_vm0, %v622_v39  ;;  %3573 = vpow2.f32 %v1938_v25  ;;  %v2160_v39 = vsel %vm440_vm0, %v4432_v56, 0.0 }
 0x7f7   : > { %v3566_v46 = vpop.eup %3565 }
 0x7f8   : > { %v624_v33 = vpop.permute.xlu0 %623  ;;  %v1292_v5 = vsel %vm440_vm0, %v3566_v46, 0.0 }
 0x7f9   : > { %629 = vst.msk [vmem:[#allocation3 + $0x38] sm:$0xff] %vm440_vm0, %v624_v33  ;;  %v640_v41 = vpop.permute.xlu1 %639  ;;  %v4459_v21 = vld [vmem:[#allocation3 + $0x28] sm:$0xff] }
 0x7fa   : > { %646 = vst.msk [vmem:[#allocation3 + $0x50] sm:$0xff] %vm440_vm0, %v640_v41 }
 0x7fb   : > { %v3568_v49 = vpop.eup %3567 }
 0x7fc   : > { %v642_v22 = vpop.permute.xlu0 %641  ;;  %v4457_v10 = vld [vmem:[#allocation3 + $0x20] sm:$0xff]  ;;  %v3570_v53 = vpop.eup %3569  ;;  %v1506_v7 = vsel %vm440_vm0, %v3568_v49, 0.0 }
 0x7fd   : > { %647 = vst.msk [vmem:[#allocation3 + $0x58] sm:$0xff] %vm440_vm0, %v642_v22  ;;  %v3347_v24 = vpack.c.bf16 %v4459_v21, %v4457_v10  ;;  %v4464_v35 = vld [vmem:[#allocation3 + $0x30] sm:$0xff] }
 0x7ff   : > { %3348 = vmatprep.subr.bf16.mxu0 %v3347_v24  ;;  %v3572_v54 = vpop.eup %3571 }
 0x800   : > { %3350 = vmatpush3.bf16.msra.mxu0 %v3347_v24  ;;  %v4466_v36 = vld [vmem:[#allocation3 + $0x38] sm:$0xff]  ;;  %v3574_v57 = vpop.eup %3573  ;;  %v1940_v29 = vsel %vm440_vm0, %v3572_v54, 0.0 }
 0x801   : > { %v3357_v43 = vpack.c.bf16 %v4466_v36, %v4464_v35  ;;  %v4472_v50 = vld [vmem:[#allocation3 + $0x50] sm:$0xff]  ;;  %v1943_v28 = vsel %vm440_vm0, %v3574_v57, 0.0 }
 0x803   : > { %3118 = vmatmul.mubr.msk.f32.vlgmr.msra.gmra.mrb[4].mxu0 %vm440_vm0, %v3566_v46  ;;  %3358 = vmatprep.subr.bf16.mxu0 %v3357_v43 }
 0x804   : > { %3360 = vmatpush3.bf16.msra.mxu0 %v3357_v43  ;;  %3131 = vmatprep.mubr.msk.f32.mxu0 %vm440_vm0, %v3568_v49  ;;  %v4474_v51 = vld [vmem:[#allocation3 + $0x58] sm:$0xff] }
 0x805   : > { %v3377_v52 = vpack.c.bf16 %v4474_v51, %v4472_v50 }
 0x807   : > { %3132 = vmatmul.mubr.msk.f32.vlgmr.msra.gmra.mrb[6].mxu0 %vm440_vm0, %v3570_v53  ;;  %3378 = vmatprep.subr.bf16.mxu0 %v3377_v52 }
 0x808   : > { %3380 = vmatpush3.bf16.msra.mxu0 %v3377_v52  ;;  %3159 = vmatprep.mubr.msk.f32.mxu0 %vm440_vm0, %v3572_v54  ;;  %v865_v54 = vsel %vm440_vm0, %v4235_v44, 0.0 }
 0x80b   : > { %3160 = vmatmul.mubr.msk.f32.vlgmr.msra.gmra.mrb[8].mxu0 %vm440_vm0, %v3574_v57 }
 0x894   : > { %v4481_v58 = vpop.f32.mrb[22].mxu1 }
 0x895   : > { %v4483_v59 = vpop.f32.mrb[23].mxu1 }
 0x89c   : > { %v3182_v60 = vpop.f32.mrb[24].mxu1 }
 0x89d   : > { %v2353_v61 = vpop.f32.mrb[25].mxu1  ;;  %v2365_v62 = vsel %vm440_vm0, %v3182_v60, -inf }
 0x89e   : > { %2366 = vmax.xlane.f32.xlu1 %v2365_v62  ;;  %v2362_v63 = vsel %vm440_vm0, %v2353_v61, -inf }
 0x89f   : > { %2363 = vmax.xlane.f32.xlu0 %v2362_v63 }
 0x8af   : > { %657 = vrot.lane.b32.xlu1 %v4182_v14, %s3858_s16 }
 0x8b5   : > { %659 = vrot.lane.b32.xlu0 %v4178_v12, %s3858_s16  ;;  %v1509_v12 = vsel %vm440_vm0, %v3570_v53, 0.0  ;;  %v868_v53 = vsel %vm440_vm0, %v4239_v45, 0.0 }
 0x8d3   : > { %1073 = vadd.xlane.f32.xlu1 %v1072_v11 }
 0x8d4   : > { %1076 = vadd.xlane.f32.xlu0 %v1075_v3 }
 0x8d6   : > { %v4496_v6 = vpop.f32.mrb[4].mxu0 }
 0x8d7   : > { %1293 = vadd.xlane.f32.xlu1 %v1292_v5  ;;  %v4500_v14 = vpop.f32.mrb[5].mxu0 }
 0x8d8   : > { %1290 = vadd.xlane.f32.xlu0 %v1289_v16 }
 0x8da   : > { %v4503_v8 = vpop.f32.mrb[6].mxu0 }
 0x8db   : > { %1510 = vadd.xlane.f32.xlu1 %v1509_v12  ;;  %v4506_v13 = vpop.f32.mrb[7].mxu0 }
 0x8dc   : > { %1507 = vadd.xlane.f32.xlu0 %v1506_v7 }
 0x8de   : > { %v4510_v27 = vpop.f32.mrb[8].mxu0 }
 0x8df   : > { %1727 = vadd.xlane.f32.xlu1 %v1726_v26  ;;  %v4514_v40 = vpop.f32.mrb[9].mxu0 }
 0x8e0   : > { %1724 = vadd.xlane.f32.xlu0 %v1723_v17 }
 0x8e3   : > { %1944 = vadd.xlane.f32.xlu1 %v1943_v28 }
 0x8e4   : > { %1941 = vadd.xlane.f32.xlu0 %v1940_v29 }
 0x8e7   : > { %2161 = vadd.xlane.f32.xlu1 %v2160_v39 }
 0x8e8   : > { %2158 = vadd.xlane.f32.xlu0 %v2157_v4 }
 0x92b   : > { %v2367_v42 = vpop.xlane.xlu1 %2366 }
 0x92c   : > { %v2369_v30 = vsub.f32 %v3182_v60, %v2367_v42  ;;  %v2364_v2 = vpop.xlane.xlu0 %2363 }
 0x92d   : > { %v2368_v33 = vsub.f32 %v2353_v61, %v2364_v2 }
 0x92e   : > { %v2372_v34 = vmul.f32 1.442695, %v2369_v30 }
 0x92f   : > { %v2370_v41 = vmul.f32 1.442695, %v2368_v33  ;;  %v658_v25 = vpop.permute.xlu1 %657 }
 0x930   : > { %3575 = vpow2.f32 %v2372_v34  ;;  %664 = vst.msk [vmem:[#allocation3 + $0x70] sm:$0xff] %vm440_vm0, %v658_v25  ;;  %v660_v22 = vpop.permute.xlu0 %659 }
 0x931   : > { %3577 = vpow2.f32 %v2370_v41  ;;  %665 = vst.msk [vmem:[#allocation3 + $0x78] sm:$0xff] %vm440_vm0, %v660_v22 }
 0x937   : > { %v4524_v56 = vld [vmem:[#allocation3 + $0x70] sm:$0xff] }
 0x938   : > { %v4526_v24 = vld [vmem:[#allocation3 + $0x78] sm:$0xff] }
 0x939   : > { %v3397_v55 = vpack.c.bf16 %v4526_v24, %v4524_v56 }
 0x93a   : > { %v3576_v43 = vpop.eup %3575 }
 0x93b   : > { %v3578_v46 = vpop.eup %3577  ;;  %3398 = vmatprep.subr.bf16.mxu0 %v3397_v55  ;;  %v2377_v49 = vsel %vm440_vm0, %v3576_v43, 0.0 }
 0x93c   : > { %3187 = vmatprep.mubr.msk.f32.mxu0 %vm440_vm0, %v3578_v46  ;;  %2378 = vadd.xlane.f32.xlu1 %v2377_v49  ;;  %v2374_v52 = vsel %vm440_vm0, %v3578_v46, 0.0 }
 0x93d   : > { %3400 = vmatpush3.bf16.msra.mxu0 %v3397_v55  ;;  %2375 = vadd.xlane.f32.xlu0 %v2374_v52 }
 0x940   : > { %3188 = vmatmul.mubr.msk.f32.vlgmr.msra.gmra.mrb[10].mxu0 %vm440_vm0, %v3576_v43  ;;  %869 = vadd.xlane.f32.xlu1 %v868_v53  ;;  %v2489_v53 = vld [vmem:[#allocation13 + $0x18] sm:$0xff] }
 0x941   : > { %866 = vadd.xlane.f32.xlu0 %v865_v54 }
 0x960   : > { %v1074_v57 = vpop.xlane.xlu1 %1073 }
 0x961   : > { %3579 = vrcp.f32 %v1074_v57  ;;  %v1077_v60 = vpop.xlane.xlu0 %1076  ;;  %v2490_v57 = vld [vmem:[#allocation13 + $0x20] sm:$0xff] }
 0x962   : > { %3581 = vrcp.f32 %v1077_v60  ;;  %v2492_v60 = vld [vmem:[#allocation13 + $0x30] sm:$0xff] }
 0x964   : > { %v1294_v61 = vpop.xlane.xlu1 %1293 }
 0x965   : > { %3583 = vrcp.f32 %v1294_v61  ;;  %v1291_v62 = vpop.xlane.xlu0 %1290  ;;  %v2494_v61 = vld [vmem:[#allocation13 + $0x40] sm:$0xff] }
 0x966   : > { %3585 = vrcp.f32 %v1291_v62  ;;  %v2495_v62 = vld [vmem:[#allocation13 + $0x48] sm:$0xff] }
 0x968   : > { %v1511_v63 = vpop.xlane.xlu1 %1510 }
 0x969   : > { %3587 = vrcp.f32 %v1511_v63  ;;  %v1508_v11 = vpop.xlane.xlu0 %1507  ;;  %v3417_v63 = vpack.c.bf16 %v2495_v62, %v2494_v61 }
 0x96a   : > { %3589 = vrcp.f32 %v1508_v11  ;;  %v2496_v11 = vld [vmem:[#allocation13 + $0x50] sm:$0xff] }
 0x96b   : > { %v3580_v45 = vpop.eup %3579 }
 0x96c   : > { %v3582_v3 = vpop.eup %3581  ;;  %v1728_v5 = vpop.xlane.xlu1 %1727  ;;  %v1163_v16 = vmul.f32 %v3580_v45, %v4328_v38  ;;  %v2497_v45 = vld [vmem:[#allocation13 + $0x58] sm:$0xff] }
 0x96d   : > { %3591 = vrcp.f32 %v1728_v5  ;;  %v1725_v44 = vpop.xlane.xlu0 %1724  ;;  %v1164_v12 = vmul.f32 %v3582_v3, %v4326_v37  ;;  %v3421_v3 = vpack.c.bf16 %v2497_v45, %v2496_v11 }
 0x96e   : > { %3593 = vrcp.f32 %v1725_v44  ;;  %v1169_v7 = vsub.f32 %v1163_v16, %v4282_v0 }
 0x96f   : > { %v3584_v26 = vpop.eup %3583  ;;  %v1170_v17 = vsub.f32 %v1164_v12, %v4284_v1 }
 0x970   : > { %v3586_v28 = vpop.eup %3585  ;;  %1173 = vrot.lane.b32.xlu0 %v1169_v7, %s3858_s16  ;;  %v1945_v29 = vpop.xlane.xlu1 %1944  ;;  %v1381_v39 = vmul.f32 %v3584_v26, %v4496_v6 }
 0x971   : > { %3595 = vrcp.f32 %v1945_v29  ;;  %v1942_v4 = vpop.xlane.xlu0 %1941  ;;  %1175 = vrot.lane.b32.xlu1 %v1170_v17, %s3858_s16  ;;  %v1380_v38 = vmul.f32 %v3586_v28, %v4500_v14 }
 0x972   : > { %3597 = vrcp.f32 %v1942_v4  ;;  %v1387_v37 = vsub.f32 %v1381_v39, %v4459_v21 }
 0x973   : > { %v3588_v42 = vpop.eup %3587  ;;  %v1386_v0 = vsub.f32 %v1380_v38, %v4457_v10 }
 0x974   : > { %v3590_v30 = vpop.eup %3589  ;;  %1392 = vrot.lane.b32.xlu0 %v1387_v37, %s3857_s11  ;;  %v2162_v1 = vpop.xlane.xlu1 %2161  ;;  %v1598_v2 = vmul.f32 %v3588_v42, %v4503_v8 }
 0x975   : > { %3599 = vrcp.f32 %v2162_v1  ;;  %v2159_v6 = vpop.xlane.xlu0 %2158  ;;  %1390 = vrot.lane.b32.xlu1 %v1386_v0, %s3857_s11  ;;  %v1597_v33 = vmul.f32 %v3590_v30, %v4506_v13 }
 0x976   : > { %3601 = vrcp.f32 %v2159_v6  ;;  %v1604_v14 = vsub.f32 %v1598_v2, %v4466_v36  ;;  %v2498_v6 = vld [vmem:[#allocation13 + $0x60] sm:$0xff] }
 0x977   : > { %v3592_v34 = vpop.eup %3591  ;;  %v1603_v21 = vsub.f32 %v1597_v33, %v4464_v35  ;;  %v2499_v33 = vld [vmem:[#allocation13 + $0x68] sm:$0xff] }
 0x978   : > { %v3594_v41 = vpop.eup %3593  ;;  %1609 = vrot.lane.b32.xlu0 %v1604_v14, %s3856_s18  ;;  %v1815_v10 = vmul.f32 %v3592_v34, %v4387_v20  ;;  %v3425_v14 = vpack.c.bf16 %v2499_v33, %v2498_v6  ;;  %v2500_v34 = vld [vmem:[#allocation13 + $0x70] sm:$0xff] }
 0x979   : > { %1607 = vrot.lane.b32.xlu1 %v1603_v21, %s3856_s18  ;;  %v1814_v8 = vmul.f32 %v3594_v41, %v4389_v23  ;;  %v2501_v21 = vld [vmem:[#allocation13 + $0x78] sm:$0xff] }
 0x97a   : > { %v1821_v25 = vsub.f32 %v1815_v10, %v4315_v32  ;;  %v3429_v41 = vpack.c.bf16 %v2501_v21, %v2500_v34 }
 0x97b   : > { %v3596_v22 = vpop.eup %3595  ;;  %v1820_v13 = vsub.f32 %v1814_v8, %v4313_v31 }
 0x97c   : > { %v3598_v55 = vpop.eup %3597  ;;  %1826 = vrot.lane.b32.xlu0 %v1821_v25, %s3855_s17  ;;  %v2032_v36 = vmul.f32 %v3596_v22, %v4510_v27 }
 0x97d   : > { %1824 = vrot.lane.b32.xlu1 %v1820_v13, %s3855_s17  ;;  %v2031_v35 = vmul.f32 %v3598_v55, %v4514_v40  ;;  %v2487_v40 = vld [vmem:[#allocation13 + $0x8] sm:$0xff] }
 0x97e   : > { %v2038_v20 = vsub.f32 %v2032_v36, %v4474_v51  ;;  %v2486_v51 = vld [vmem:[#allocation13] sm:$0xff] }
 0x97f   : > { %v3600_v43 = vpop.eup %3599  ;;  %v2037_v46 = vsub.f32 %v2031_v35, %v4472_v50  ;;  %v2488_v50 = vld [vmem:[#allocation13 + $0x10] sm:$0xff]  ;;  %v3401_v52 = vpack.c.bf16 %v2487_v40, %v2486_v51 }
 0x980   : > { %v3602_v23 = vpop.eup %3601  ;;  %2043 = vrot.lane.b32.xlu0 %v2038_v20, %s3854_s9  ;;  %v2249_v32 = vmul.f32 %v3600_v43, %v4481_v58  ;;  %v3405_v54 = vpack.c.bf16 %v2489_v53, %v2488_v50  ;;  %v2491_v58 = vld [vmem:[#allocation13 + $0x28] sm:$0xff] }
 0x981   : > { %2041 = vrot.lane.b32.xlu1 %v2037_v46, %s3854_s9  ;;  %v2248_v31 = vmul.f32 %v3602_v23, %v4483_v59  ;;  %3402 = vmatprep.subr.bf16.mxu0 %v3401_v52  ;;  %v3409_v59 = vpack.c.bf16 %v2491_v58, %v2490_v57  ;;  %s3757_s9 = sshll.u32 %s3859_s24, 4  ;;  %s3758_s9 = int_to_ptr.vmem [resolvable:$false] %s3757_s9 }
 0x982   : > { %v2255_v27 = vsub.f32 %v2249_v32, %v4378_v15  ;;  %3404 = vmatpush3.bf16.msra.mxu0 %v3401_v52  ;;  %v2493_v15 = vld [vmem:[#allocation13 + $0x38] sm:$0xff]  ;;  %s3759_s17 = scalar_lea.vmem %s3758_s9, 512  ;;  %p3760_p3 = scmp.lt.s32.totalorder %s4590_s15, %s3758_s9 }
 0x983   : > { %v2254_v49 = vsub.f32 %v2248_v31, %v4376_v9  ;;  %3406 = vmatprep.subr.bf16.mxu0 %v3405_v54  ;;  %v3413_v9 = vpack.c.bf16 %v2493_v15, %v2492_v60 }
 0x984   : > { %2260 = vrot.lane.b32.xlu0 %v2255_v27, %s3853_s7 }
 0x985   : > { %2258 = vrot.lane.b32.xlu1 %v2254_v49, %s3853_s7  ;;  %s3753_s7 = scalar_lea.vmem %s4590_s15, 256 }
 0x986   : > { %3408 = vmatpush3.bf16.msra.mxu0 %v3405_v54  ;;  %p3754_p8 = scmp.ne.s32.totalorder %s4590_s15, %s3753_s7  ;;  %p3761_p7 = scmp.lt.s32.totalorder %s3759_s17, %s3753_s7 }
 0x987   : > { %3410 = vmatprep.subr.bf16.mxu0 %v3409_v59 }
 0x988   : > { %p3755_p6 = pnand %p3754_p8, %p4081_p5  ;;  %p3762_p9 = por %p3761_p7, %p3760_p3 }
 0x98a   : > { %3412 = vmatpush3.bf16.msra.mxu0 %v3409_v59  ;;  %p3756_p10 = pneg %p3755_p6 }
 0x98b   : > { %3414 = vmatprep.subr.bf16.mxu0 %v3413_v9 }
 0x98c   : > { %p3763_p0 = pnand %p3762_p9, %p3756_p10 }
 0x98e   : > { %3416 = vmatpush3.bf16.msra.mxu0 %v3413_v9 }
 0x98f   : > { %3418 = vmatprep.subr.bf16.mxu0 %v3417_v63 }
 0x992   : > { %3420 = vmatpush3.bf16.msra.mxu0 %v3417_v63 }
 0x993   : > { %3422 = vmatprep.subr.bf16.mxu0 %v3421_v3 }
 0x996   : > { %3424 = vmatpush3.bf16.msra.mxu0 %v3421_v3 }
 0x997   : > { %3426 = vmatprep.subr.bf16.mxu0 %v3425_v14 }
 0x99a   : > { %3428 = vmatpush3.bf16.msra.mxu0 %v3425_v14 }
 0x99b   : > { %3430 = vmatprep.subr.bf16.mxu0 %v3429_v41 }
 0x99e   : > { %3432 = vmatpush3.bf16.msra.mxu0 %v3429_v41 }
 0x9c9   : > { %v2379_v5 = vpop.xlane.xlu1 %2378 }
 0x9ca   : > { %v2376_v16 = vpop.xlane.xlu0 %2375 }
 0x9cd   : > { %v870_v44 = vpop.xlane.xlu1 %869 }
 0x9ce   : > { %3603 = vrcp.f32 %v870_v44  ;;  %v867_v12 = vpop.xlane.xlu0 %866 }
 0x9cf   : > { %3605 = vrcp.f32 %v867_v12 }
 0x9d0   : > { %3607 = vrcp.f32 %v2379_v5 }
 0x9d1   : > { %3609 = vrcp.f32 %v2376_v16 }
 0x9d8   : > { %v3604_v7 = vpop.eup %3603 }
 0x9d9   : > { %v3606_v26 = vpop.eup %3605  ;;  %v957_v17 = vmul.f32 %v3604_v7, %v4247_v47 }
 0x9da   : > { %v956_v28 = vmul.f32 %v3606_v26, %v4249_v48  ;;  %v3608_v10 = vpop.eup %3607 }
 0x9db   : > { %v962_v29 = vsub.f32 %v957_v17, %v4196_v18  ;;  %v3610_v25 = vpop.eup %3609 }
 0x9dc   : > { %v961_v39 = vsub.f32 %v956_v28, %v4198_v19 }
 0x9dd   : > { %964 = vst.msk [vmem:[#allocation4 + $0x8] sm:$0xff] %vm440_vm0, %v962_v29 }
 0x9de   : > { %963 = vst.msk [vmem:[#allocation4] sm:$0xff] %vm440_vm0, %v961_v39 }
 0x9e2   : > { %v1174_v4 = vpop.permute.xlu0 %1173 }
 0x9e3   : > { %1180 = vst.msk [vmem:[#allocation4] sm:$0xff] %vm1179_vm2, %v1174_v4  ;;  %v1176_v38 = vpop.permute.xlu1 %1175 }
 0x9e4   : > { %1181 = vst.msk [vmem:[#allocation4 + $0x8] sm:$0xff] %vm1179_vm2, %v1176_v38 }
 0x9e6   : > { %v1393_v37 = vpop.permute.xlu0 %1392 }
 0x9e7   : > { %1398 = vst.msk [vmem:[#allocation4 + $0x8] sm:$0xff] %vm1396_vm3, %v1393_v37  ;;  %v1391_v42 = vpop.permute.xlu1 %1390 }
 0x9e8   : > { %1397 = vst.msk [vmem:[#allocation4] sm:$0xff] %vm1396_vm3, %v1391_v42 }
 0x9ea   : > { %v1610_v47 = vpop.permute.xlu0 %1609 }
 0x9eb   : > { %1615 = vst.msk [vmem:[#allocation4 + $0x8] sm:$0xff] %vm1613_vm4, %v1610_v47  ;;  %v1608_v18 = vpop.permute.xlu1 %1607 }
 0x9ec   : > { %1614 = vst.msk [vmem:[#allocation4] sm:$0xff] %vm1613_vm4, %v1608_v18 }
 0x9ee   : > { %v1827_v19 = vpop.permute.xlu0 %1826 }
 0x9ef   : > { %1832 = vst.msk [vmem:[#allocation4 + $0x8] sm:$0xff] %vm1830_vm5, %v1827_v19  ;;  %v1825_v48 = vpop.permute.xlu1 %1824 }
 0x9f0   : > { %1831 = vst.msk [vmem:[#allocation4] sm:$0xff] %vm1830_vm5, %v1825_v48 }
 0x9f2   : > { %v2044_v0 = vpop.permute.xlu0 %2043 }
 0x9f3   : > { %2049 = vst.msk [vmem:[#allocation4 + $0x8] sm:$0xff] %vm2047_vm6, %v2044_v0  ;;  %v2042_v30 = vpop.permute.xlu1 %2041 }
 0x9f4   : > { %2048 = vst.msk [vmem:[#allocation4] sm:$0xff] %vm2047_vm6, %v2042_v30 }
 0x9f6   : > { %v2261_v1 = vpop.permute.xlu0 %2260 }
 0x9f7   : > { %2266 = vst.msk [vmem:[#allocation4 + $0x8] sm:$0xff] %vm2264_vm7, %v2261_v1  ;;  %v2259_v2 = vpop.permute.xlu1 %2258 }
 0x9f8   : > { %2265 = vst.msk [vmem:[#allocation4] sm:$0xff] %vm2264_vm7, %v2259_v2 }
 0xa13   : > { %v3189_v8 = vpop.f32.mrb[10].mxu0 }
 0xa14   : > { %v2466_v22 = vmul.f32 %v3608_v10, %v3189_v8  ;;  %v2452_v13 = vpop.f32.mrb[11].mxu0 }
 0xa15   : > { %v2465_v55 = vmul.f32 %v3610_v25, %v2452_v13 }
 0xa16   : > { %v2472_v36 = vsub.f32 %v2466_v22, %v4526_v24 }
 0xa17   : > { %v2471_v35 = vsub.f32 %v2465_v55, %v4524_v56  ;;  %v2829_v56 = vld [vmem:[%s4649_s5] ss:$0 sm:$0xff] }
 0xa18   : > { %2477 = vrot.lane.b32.xlu0 %v2472_v36, %s3852_s29 }
 0xa19   : > { %2475 = vrot.lane.b32.xlu1 %v2471_v35, %s3852_s29  ;;  %s4595_s29 = scalar_lea.hbm %s4676_s14, %s2836_s19 }
 0xa8a   : > { %v2478_v20 = vpop.permute.xlu0 %2477 }
 0xa8b   : > { %2483 = vst.msk [vmem:[#allocation4 + $0x8] sm:$0xff] %vm2481_vm8, %v2478_v20  ;;  %v2476_v43 = vpop.permute.xlu1 %2475 }
 0xa8c   : > { %2482 = vst.msk [vmem:[#allocation4] sm:$0xff] %vm2481_vm8, %v2476_v43 }
 0xa92   : > { %v2485_v23 = vld [vmem:[#allocation4 + $0x8] sm:$0xff] }
 0xa93   : > { %v2484_v46 = vld [vmem:[#allocation4] sm:$0xff] }
 0xa94   : > { %3222 = vmatprep.mubr.f32.mxu0 %v2484_v46 }
 0xa95   : > { %3223 = vmatmul.mubr.f32.vlgmr.msra.gmra.mrb[12].mxu0 %v2485_v23 }
 0xb68   : > { %v3224_v24 = vpop.f32.mrb[12].mxu0 }
 0xb69   : > { %v2581_v32 = vadd.f32 %v3224_v24, %v2829_v56  ;;  %v2575_v31 = vpop.f32.mrb[13].mxu0 }
 0xb6a   : > { %v2576_v27 = vadd.f32 %v2829_v56, %v2575_v31 }
 0xb6b   : > { %2585 = vst [vmem:[%s341_s6 + $0x8] sm:$0xff] %v2581_v32 }
 0xb6c   : > { %2584 = vst [vmem:[%s341_s6] sm:$0xff] %v2576_v27 }
 0xb6d   : > { %3766 = shalt.err (!%p3763_p0)
}
 0xb6e   : > { %s3767_s18 = scalar_lea.hbm %s4595_s29, 256  ;;  %s3771_s6 = scalar_lea.hbm %s4676_s14, 512 }
 0xb6f   : > { %p3768_p4 = scmp.ne.s32.totalorder %s4595_s29, %s3767_s18  ;;  %p3772_p12 = scmp.lt.u32.totalorder %s4595_s29, %s4676_s14 }
 0xb70   : > { %p3773_p1 = scmp.lt.u32.totalorder %s3771_s6, %s3767_s18  ;;  %p3775_p8 = scmp.lt.u32.totalorder %s3767_s18, %s4595_s29 }
 0xb71   : > { %p3769_p13 = pnand %p3768_p4, %p4081_p5 }
 0xb72   : > { %p3774_p11 = por %p3773_p1, %p3772_p12 }
 0xb73   : > { %p3770_p2 = pneg %p3769_p13 }
 0xb74   : > { %p3776_p6 = por %p3775_p8, %p3774_p11 }
 0xb76   : > { %p3777_p10 = pnand %p3776_p6, %p3770_p2 }
 0xb78   : > { %3780 = shalt.err (!%p3777_p10)
}
 0xb79   : > { %s3860_s19 = smov 128   ;;  %s3861_s8 = smov 8  }
 0xb7a   : > { %3451 = dma.vmem_to_hbm [thread:$0]  (%p4081_p5), %s4590_s15, 256, %s4595_s29, %s2587_s27, %s3860_s19, %s3860_s19, %s3861_s8  }
 0xb7b PF: > { %s4677_s13 = sld [smem:[#allocation19_spill]]  ;;  %s4678_s7 = sld [smem:[#allocation20_spill]] }
 0xb7c   : > { %p4680_p7 = scmp.ge.s32.totalorder %s3843_s26, 2 }
 0xb81   : > { %s2617_s24 = sand.u32 1, %s4677_s13   ;;  %p4679_p3 = scmp.ne.s32.totalorder %s4678_s7, 0 }
 0xb82   : > { %s2618_s9 = scalar_lea.sflag [#allocation7], %s2617_s24 }
 0xb83   : > { %p3471_p9 = pnand %p4680_p7, %p4679_p3 }
 0xb85   : > { %3818 = dma.done.wait (!%p3471_p9), %s2618_s9, 256  }
 0xb86   : > { %3820 = vsyncadd (!%p3471_p9), %s2618_s9, 4294967040  ;;  %s24_s26 = sadd.s32 1, %s3843_s26   ;;  %s4681_s21 = smov %s3827_s22 }
 0xb87   : > { %p21_p0 = scmp.ge.s32.totalorder %s24_s26, 4   ;;  %s4682_s22 = smov %s3831_s23 }
 0xb88   : > { %s4683_s23 = smov %s4090_s10  ;;  %s4684_s24 = smov %s3839_s25 }
 0xb89   : > { %s4685_s25 = smov %s4687_s28  ;;  %23 = sbr.rel (!%p21_p0) target bundleno = 10 (0xa), region = 146 }
 0xb90   :  { %2623 = vsyncpa [#allocation6], 1 }
 0xb91   :  { %2625 = vsyncpa [#allocation6 + $0x1], 1 }
 0xb92   :  { %2626 = vsyncpa [#allocation9], 1 }
 0xb93   :  { %2627 = vsyncpa [#allocation12], 1 }
 0xb94   :  { %2628 = vsyncpa [#allocation7], 1 }
 0xb95   :  { %2630 = vsyncpa [#allocation7 + $0x1], 1 }

</bundles_post_ra>
